<compile_context>
chip_gen: v6e
topology: v6e:2x2x1
jax: 0.10.0
libtpu: 0.0.40
codegen_flags: <defaults>
</compile_context>

<pallas_src>
import functools

import jax
import jax.numpy as jnp
from jax import lax
from jax.experimental import pallas as pl
from jax.experimental.pallas import tpu as pltpu


def _round_up(x, m):
    return (x + m - 1) // m * m


def aft_conv_kernel(x_ref, wqkv_ref, bqkv_ref, wo_ref, bo_ref,
                    wpack_ref, mask_ref, rowok_ref, o_ref,
                    *, shifts, bt, hwp, c):
    """One grid step: `bt` images, each flattened to (hwp, c) channels-last."""
    m = bt * hwp
    x = x_ref[...].reshape(m, c)                       # bf16; hwp is 8-aligned -> free

    # Fused QKV projection: one wide MXU matmul, f32 accumulation.
    qkv = jnp.dot(x, wqkv_ref[...],
                  preferred_element_type=jnp.float32) + bqkv_ref[...]
    q = qkv[:, :c]
    k = qkv[:, c:2 * c]
    v = qkv[:, 2 * c:]

    # Numerically-stabilized exp: subtract the per-image per-channel max of k.
    # Both num and den are scaled by the same exp(-kmax), so the ratio (and the
    # output) is mathematically unchanged.
    k3 = k.reshape(bt, hwp, c)
    kmax = jnp.max(k3, axis=1, keepdims=True)                       # (bt,1,c)
    ek = jnp.exp(k3 - kmax).reshape(m, c)                           # (m,c)

    # Lane-packed [exp(k)*v | exp(k)]; rowok zeroes padded rows so the global
    # sums (and any roll leakage from pad rows) are exact.
    pk = jnp.concatenate([ek * v, ek], axis=-1) * rowok_ref[...]    # (m, 2c) f32

    # Local ks*ks depthwise term: per tap one static sublane roll (XLU) plus
    # VPU multiply-adds.  mask (m,1) kills out-of-image / cross-image
    # neighbors; wpack (1,2c) carries exp(w)-1 per channel, duplicated for the
    # num|den halves.  (The ks^2 * m * c dense weight tensor is never formed.)
    acc = None
    for t, amt in enumerate(shifts):                                # static unroll
        src = pk if amt == 0 else pltpu.roll(pk, shift=amt, axis=0)
        contrib = wpack_ref[t] * src
        if amt != 0:          # center tap: mask is all-ones in-image, pk already 0 on pad rows
            contrib = mask_ref[t] * contrib
        acc = contrib if acc is None else acc + contrib

    # Global (all positions of the same image) term, added via a (bt,1,2c)
    # broadcast in the expression — no (m, c) broadcast materializations.
    gsum = jnp.sum(pk.reshape(bt, hwp, 2 * c), axis=1, keepdims=True)
    tot = acc.reshape(bt, hwp, 2 * c) + gsum
    num = tot[..., :c]
    den = tot[..., c:]
    # TODO(synk): den = global + (exp(w)-1)-correction can cancel badly when w is
    # strongly negative and ks ~ H,W; a windowed exp(k+w) form would avoid it.

    y = jax.nn.sigmoid(q).reshape(bt, hwp, c) * num * pl.reciprocal(den, approx=True)

    # y is cast to bf16 for the output projection (f32 accumulate on the MXU).
    out = jnp.dot(y.reshape(m, c).astype(wo_ref.dtype), wo_ref[...],
                  preferred_element_type=jnp.float32) + bo_ref[...]
    o_ref[...] = out.reshape(bt, hwp, c).astype(o_ref.dtype)


def aft_conv_forward(x_nchw, params, heads, kernel_size, block_b=None):
    B, C, H, W = x_nchw.shape
    HW = H * W
    ks = kernel_size
    p = ks // 2
    dh = C // heads
    f32 = jnp.float32

    # Lane-dense channel dim: 256-multiples keep the 256-wide v6e/v7x MXU fully
    # utilized for production channel counts; 128 is the floor for small C.
    Cp = _round_up(C, 256) if C > 128 else _round_up(C, 128)
    # Sublane-aligned flattened spatial dim so (Bt,HWp,C)<->(Bt*HWp,C) is free.
    HWp = _round_up(HW, 8)

    # Batch block: largest divisor of B with Bt*HWp <= 512 (keeps the ~12-16
    # live (M,C)/(M,2C)/(M,3C) f32 intermediates inside v7x's 64 MiB VMEM) that
    # still leaves >= 2 grid steps so both v7x TensorCores get work.
    if block_b is None:
        block_b = 1
        for cand in range(1, B + 1):
            if B % cand != 0 or cand * HWp > 512:
                continue
            if B > 1 and B // cand < 2:
                continue
            block_b = cand
    Bt = block_b
    M = Bt * HWp

    # ---- layout glue: NCHW -> (B, HWp, Cp) channels-last, bf16 for the MXU ----
    xf = jnp.transpose(x_nchw, (0, 2, 3, 1)).reshape(B, HW, C).astype(f32)
    xf = jnp.pad(xf, ((0, 0), (0, HWp - HW), (0, Cp - C))).astype(jnp.bfloat16)

    def pad_w(w):      # (C, C) -> (Cp, Cp), zero padded
        return jnp.zeros((Cp, Cp), f32).at[:C, :C].set(w.astype(f32))

    def pad_b(b):      # (C,) -> (1, Cp), zero padded
        return jnp.zeros((1, Cp), f32).at[0, :C].set(b.astype(f32))

    wqkv = jnp.concatenate(
        [pad_w(params["wq"]), pad_w(params["wk"]), pad_w(params["wv"])],
        axis=1).astype(jnp.bfloat16)                                  # (Cp, 3Cp)
    bqkv = jnp.concatenate(
        [pad_b(params["bq"]), pad_b(params["bk"]), pad_b(params["bv"])],
        axis=1)                                                       # (1, 3Cp) f32
    wo = pad_w(params["wo"]).astype(jnp.bfloat16)                     # (Cp, Cp)
    bo = pad_b(params["bo"])                                          # (1, Cp)

    # ---- factored position-bias operands (NO dense (ks^2, M, Cp) tensor) ----
    weff = jnp.exp(params["pos_w"].reshape(heads, ks * ks).astype(f32)) - 1.0
    w_chan = jnp.repeat(weff, dh, axis=0).T                           # (ks*ks, C)
    w_chan = jnp.pad(w_chan, ((0, 0), (0, Cp - C)))                   # (ks*ks, Cp)
    wpack = jnp.concatenate([w_chan, w_chan], axis=1)[:, None, :]     # (ks*ks, 1, 2Cp)

    idx = jnp.arange(HW)
    ri, ci = idx // W, idx % W
    masks, shifts = [], []
    for a in range(ks):
        for b in range(ks):
            dy, dx = a - p, b - p
            valid = ((ri + dy >= 0) & (ri + dy < H) &
                     (ci + dx >= 0) & (ci + dx < W)).astype(f32)      # (HW,)
            valid = jnp.pad(valid, (0, HWp - HW))                     # zero pad rows
            masks.append(jnp.tile(valid, (Bt,)))                      # (M,)
            # roll amount so that rolled[i] = pk[i + dy*W + dx]  (static int)
            shifts.append((-(dy * W + dx)) % M)
    masks = jnp.stack(masks, axis=0)[:, :, None]                      # (ks*ks, M, 1)
    rowok = jnp.tile(jnp.pad(jnp.ones((HW,), f32), (0, HWp - HW)),
                     (Bt,))[:, None]                                  # (M, 1)

    kernel = functools.partial(aft_conv_kernel, shifts=tuple(shifts),
                               bt=Bt, hwp=HWp, c=Cp)

    Mtot = B * HWp
    cost = pl.CostEstimate(
        flops=int(2 * Mtot * Cp * 4 * Cp + Mtot * Cp * (8 * ks * ks + 24)),
        transcendentals=int(3 * Mtot * Cp),
        bytes_accessed=int(xf.size) * 2 + Mtot * Cp * 2
        + int(wqkv.size) * 2 + int(wo.size) * 2 + int(bqkv.size + bo.size) * 4
        + int(wpack.size) * 4 + int(masks.size) * 4 + int(rowok.size) * 4,
    )

    inv = dict(pipeline_mode=pl.Buffered(1))   # grid-invariant operands: 1 buffer

    out_flat = pl.pallas_call(
        kernel,
        out_shape=jax.ShapeDtypeStruct((B, HWp, Cp), jnp.bfloat16),
        grid_spec=pltpu.PrefetchScalarGridSpec(
            num_scalar_prefetch=0,
            grid=(B // Bt,),
            in_specs=[
                pl.BlockSpec((Bt, HWp, Cp), lambda i: (i, 0, 0)),            # x
                pl.BlockSpec((Cp, 3 * Cp), lambda i: (0, 0), **inv),         # Wqkv
                pl.BlockSpec((1, 3 * Cp), lambda i: (0, 0), **inv),          # bqkv
                pl.BlockSpec((Cp, Cp), lambda i: (0, 0), **inv),             # Wo
                pl.BlockSpec((1, Cp), lambda i: (0, 0), **inv),              # bo
                pl.BlockSpec((ks * ks, 1, 2 * Cp), lambda i: (0, 0, 0), **inv),  # per-chan tap weights
                pl.BlockSpec((ks * ks, M, 1), lambda i: (0, 0, 0), **inv),       # boundary masks
                pl.BlockSpec((M, 1), lambda i: (0, 0), **inv),                   # valid-row mask
            ],
            out_specs=pl.BlockSpec((Bt, HWp, Cp), lambda i: (i, 0, 0)),
        ),
        compiler_params=pltpu.CompilerParams(
            dimension_semantics=("parallel",),
            vmem_limit_bytes=32 * 1024 * 1024,
        ),
        cost_estimate=cost,
    )(xf, wqkv, bqkv, wo, bo, wpack, masks, rowok)

    # Glue back to the module's NCHW / f32 contract.
    # TODO(synk): keep NHWC / padded-C downstream to avoid this extra HBM pass.
    out = out_flat[:, :HW, :C].astype(f32).reshape(B, H, W, C)
    return jnp.transpose(out, (0, 3, 1, 2))


def aft_conv_reference(x_nchw, params, heads, kernel_size):
    """Pure-JAX reference using lax depthwise conv (independent code path)."""
    B, C, H, W = x_nchw.shape
    ks = kernel_size
    dh = C // heads
    xf = jnp.transpose(x_nchw, (0, 2, 3, 1)).reshape(B, H * W, C).astype(jnp.float32)

    q = xf @ params["wq"] + params["bq"]
    k = xf @ params["wk"] + params["bk"]
    v = xf @ params["wv"] + params["bv"]
    ek = jnp.exp(k)
    ekv = ek * v

    kern = jnp.exp(params["pos_w"]) - 1.0                 # (heads, ks, ks)
    kern = jnp.repeat(kern, dh, axis=0)                   # (C, ks, ks)
    kern = jnp.transpose(kern, (1, 2, 0))[:, :, None, :]  # (ks, ks, 1, C) HWIO

    def dwconv(img):
        img4 = img.reshape(B, H, W, C)
        out = lax.conv_general_dilated(
            img4, kern, (1, 1), "SAME",
            dimension_numbers=("NHWC", "HWIO", "NHWC"),
            feature_group_count=C)
        return out.reshape(B, H * W, C)

    num = dwconv(ekv) + jnp.sum(ekv, axis=1, keepdims=True)
    den = dwconv(ek) + jnp.sum(ek, axis=1, keepdims=True)
    y = jax.nn.sigmoid(q) * num / den
    out = y @ params["wo"] + params["bo"]
    return jnp.transpose(out.reshape(B, H, W, C), (0, 3, 1, 2))


if __name__ == "__main__":
    B, C, H, W = 2, 16, 8, 8
    heads, ks = 4, 3

    key = jax.random.PRNGKey(0)
    keys = jax.random.split(key, 10)
    params = {
        "wq": 0.1 * jax.random.normal(keys[0], (C, C), jnp.float32),
        "wk": 0.1 * jax.random.normal(keys[1], (C, C), jnp.float32),
        "wv": 0.1 * jax.random.normal(keys[2], (C, C), jnp.float32),
        "wo": 0.1 * jax.random.normal(keys[3], (C, C), jnp.float32),
        "bq": 0.01 * jax.random.normal(keys[4], (C,), jnp.float32),
        "bk": 0.01 * jax.random.normal(keys[5], (C,), jnp.float32),
        "bv": 0.01 * jax.random.normal(keys[6], (C,), jnp.float32),
        "bo": 0.01 * jax.random.normal(keys[7], (C,), jnp.float32),
        "pos_w": 0.1 * jax.random.normal(keys[8], (heads, ks, ks), jnp.float32),
    }
    x = jax.random.normal(keys[9], (B, C, H, W), jnp.float32)

    out = aft_conv_forward(x, params, heads, ks)
    out = jax.block_until_ready(out)
    assert out.shape == (B, C, H, W)

    ref = aft_conv_reference(x, params, heads, ks)
    if not bool(jnp.allclose(out, ref, atol=3e-2, rtol=3e-2)):
        raise AssertionError("Pallas AFT-Conv output does not match JAX reference")

    print("KERNEL_OK")
</pallas_src>

<mosaic_0001>
module attributes {stable_mosaic.version = 11 : i64} {
  func.func @aft_conv_kernel(%arg0: i32, %arg1: memref<1x64x128xbf16, #tpu.memory_space<vmem>>, %arg2: memref<128x384xbf16, #tpu.memory_space<vmem>>, %arg3: memref<1x384xf32, #tpu.memory_space<vmem>>, %arg4: memref<128x128xbf16, #tpu.memory_space<vmem>>, %arg5: memref<1x128xf32, #tpu.memory_space<vmem>>, %arg6: memref<9x1x256xf32, #tpu.memory_space<vmem>>, %arg7: memref<9x64x1xf32, #tpu.memory_space<vmem>>, %arg8: memref<64x1xf32, #tpu.memory_space<vmem>>, %arg9: memref<1x64x128xbf16, #tpu.memory_space<vmem>>) attributes {dimension_semantics = [#tpu.dimension_semantics<parallel>], iteration_bounds = array<i64: 2>, scalar_prefetch = 0 : i64, scratch_operands = 0 : i64, tpu.core_type = #tpu.core_type<tc>, window_params = [{transform_indices = @transform_0, window_bounds = array<i64: 1, 64, 128>}, {pipeline_mode = #tpu.pipeline_mode<synchronous>, transform_indices = @transform_1, window_bounds = array<i64: 128, 384>}, {pipeline_mode = #tpu.pipeline_mode<synchronous>, transform_indices = @transform_2, window_bounds = array<i64: 1, 384>}, {pipeline_mode = #tpu.pipeline_mode<synchronous>, transform_indices = @transform_3, window_bounds = array<i64: 128, 128>}, {pipeline_mode = #tpu.pipeline_mode<synchronous>, transform_indices = @transform_4, window_bounds = array<i64: 1, 128>}, {pipeline_mode = #tpu.pipeline_mode<synchronous>, transform_indices = @transform_5, window_bounds = array<i64: 9, 1, 256>}, {pipeline_mode = #tpu.pipeline_mode<synchronous>, transform_indices = @transform_6, window_bounds = array<i64: 9, 64, 1>}, {pipeline_mode = #tpu.pipeline_mode<synchronous>, transform_indices = @transform_7, window_bounds = array<i64: 64, 1>}, {transform_indices = @transform_8, window_bounds = array<i64: 1, 64, 128>}]} {
    %c0 = arith.constant 0 : index
    %c0_0 = arith.constant 0 : index
    %c0_1 = arith.constant 0 : index
    %0 = vector.load %arg1[%c0, %c0_0, %c0_1] : memref<1x64x128xbf16, #tpu.memory_space<vmem>>, vector<1x64x128xbf16>
    %1 = vector.shape_cast %0 : vector<1x64x128xbf16> to vector<64x128xbf16>
    %c0_2 = arith.constant 0 : index
    %c0_3 = arith.constant 0 : index
    %2 = vector.load %arg2[%c0_2, %c0_3] : memref<128x384xbf16, #tpu.memory_space<vmem>>, vector<128x384xbf16>
    %cst = arith.constant dense<0.000000e+00> : vector<64x384xf32>
    %3 = tpu.matmul %1, %2, %cst {dimension_numbers = #tpu.dot_dimension_numbers<[1], [0], [0], [1], [0, 0, 1, 1], [], []>} : vector<64x128xbf16>, vector<128x384xbf16>, vector<64x384xf32> -> vector<64x384xf32>
    %c0_4 = arith.constant 0 : index
    %c0_5 = arith.constant 0 : index
    %4 = vector.load %arg3[%c0_4, %c0_5] : memref<1x384xf32, #tpu.memory_space<vmem>>, vector<1x384xf32>
    %5 = vector.broadcast %4 : vector<1x384xf32> to vector<64x384xf32>
    %6 = arith.addf %3, %5 : vector<64x384xf32>
    %7 = vector.extract_strided_slice %6 {offsets = [0, 0], sizes = [64, 128], strides = [1, 1]} : vector<64x384xf32> to vector<64x128xf32>
    %8 = vector.extract_strided_slice %6 {offsets = [0, 128], sizes = [64, 128], strides = [1, 1]} : vector<64x384xf32> to vector<64x128xf32>
    %9 = vector.extract_strided_slice %6 {offsets = [0, 256], sizes = [64, 128], strides = [1, 1]} : vector<64x384xf32> to vector<64x128xf32>
    %10 = vector.shape_cast %8 : vector<64x128xf32> to vector<1x64x128xf32>
    %cst_6 = arith.constant dense<0xFF800000> : vector<1x128xf32>
    %11 = vector.multi_reduction <maximumf>, %10, %cst_6 [1] : vector<1x64x128xf32> to vector<1x128xf32>
    %12 = vector.shape_cast %11 : vector<1x128xf32> to vector<1x1x128xf32>
    %13 = vector.broadcast %12 : vector<1x1x128xf32> to vector<1x64x128xf32>
    %14 = arith.subf %10, %13 : vector<1x64x128xf32>
    %15 = math.exp %14 : vector<1x64x128xf32>
    %16 = vector.shape_cast %15 : vector<1x64x128xf32> to vector<64x128xf32>
    %17 = arith.mulf %16, %9 : vector<64x128xf32>
    %18 = tpu.concatenate %17, %16 in 1 : vector<64x128xf32>, vector<64x128xf32> -> vector<64x256xf32>
    %c0_7 = arith.constant 0 : index
    %c0_8 = arith.constant 0 : index
    %19 = vector.load %arg8[%c0_7, %c0_8] : memref<64x1xf32, #tpu.memory_space<vmem>>, vector<64x1xf32>
    %20 = vector.broadcast %19 : vector<64x1xf32> to vector<64x256xf32>
    %21 = arith.mulf %18, %20 : vector<64x256xf32>
    %c9_i32 = arith.constant 9 : i32
    %22 = tpu.dynamic_rotate %21 by %c9_i32 dim 0 : vector<64x256xf32>, i32 -> vector<64x256xf32>
    %c0_9 = arith.constant 0 : index
    %c0_10 = arith.constant 0 : index
    %c0_11 = arith.constant 0 : index
    %23 = vector.load %arg6[%c0_9, %c0_10, %c0_11] : memref<9x1x256xf32, #tpu.memory_space<vmem>>, vector<1x1x256xf32>
    %24 = vector.shape_cast %23 : vector<1x1x256xf32> to vector<1x256xf32>
    %25 = vector.broadcast %24 : vector<1x256xf32> to vector<64x256xf32>
    %26 = arith.mulf %25, %22 : vector<64x256xf32>
    %c0_12 = arith.constant 0 : index
    %c0_13 = arith.constant 0 : index
    %c0_14 = arith.constant 0 : index
    %27 = vector.load %arg7[%c0_12, %c0_13, %c0_14] : memref<9x64x1xf32, #tpu.memory_space<vmem>>, vector<1x64x1xf32>
    %28 = vector.shape_cast %27 : vector<1x64x1xf32> to vector<64x1xf32>
    %29 = vector.broadcast %28 : vector<64x1xf32> to vector<64x256xf32>
    %30 = arith.mulf %29, %26 : vector<64x256xf32>
    %c8_i32 = arith.constant 8 : i32
    %31 = tpu.dynamic_rotate %21 by %c8_i32 dim 0 : vector<64x256xf32>, i32 -> vector<64x256xf32>
    %c1 = arith.constant 1 : index
    %c0_15 = arith.constant 0 : index
    %c0_16 = arith.constant 0 : index
    %32 = vector.load %arg6[%c1, %c0_15, %c0_16] : memref<9x1x256xf32, #tpu.memory_space<vmem>>, vector<1x1x256xf32>
    %33 = vector.shape_cast %32 : vector<1x1x256xf32> to vector<1x256xf32>
    %34 = vector.broadcast %33 : vector<1x256xf32> to vector<64x256xf32>
    %35 = arith.mulf %34, %31 : vector<64x256xf32>
    %c1_17 = arith.constant 1 : index
    %c0_18 = arith.constant 0 : index
    %c0_19 = arith.constant 0 : index
    %36 = vector.load %arg7[%c1_17, %c0_18, %c0_19] : memref<9x64x1xf32, #tpu.memory_space<vmem>>, vector<1x64x1xf32>
    %37 = vector.shape_cast %36 : vector<1x64x1xf32> to vector<64x1xf32>
    %38 = vector.broadcast %37 : vector<64x1xf32> to vector<64x256xf32>
    %39 = arith.mulf %38, %35 : vector<64x256xf32>
    %40 = arith.addf %30, %39 : vector<64x256xf32>
    %c7_i32 = arith.constant 7 : i32
    %41 = tpu.dynamic_rotate %21 by %c7_i32 dim 0 : vector<64x256xf32>, i32 -> vector<64x256xf32>
    %c2 = arith.constant 2 : index
    %c0_20 = arith.constant 0 : index
    %c0_21 = arith.constant 0 : index
    %42 = vector.load %arg6[%c2, %c0_20, %c0_21] : memref<9x1x256xf32, #tpu.memory_space<vmem>>, vector<1x1x256xf32>
    %43 = vector.shape_cast %42 : vector<1x1x256xf32> to vector<1x256xf32>
    %44 = vector.broadcast %43 : vector<1x256xf32> to vector<64x256xf32>
    %45 = arith.mulf %44, %41 : vector<64x256xf32>
    %c2_22 = arith.constant 2 : index
    %c0_23 = arith.constant 0 : index
    %c0_24 = arith.constant 0 : index
    %46 = vector.load %arg7[%c2_22, %c0_23, %c0_24] : memref<9x64x1xf32, #tpu.memory_space<vmem>>, vector<1x64x1xf32>
    %47 = vector.shape_cast %46 : vector<1x64x1xf32> to vector<64x1xf32>
    %48 = vector.broadcast %47 : vector<64x1xf32> to vector<64x256xf32>
    %49 = arith.mulf %48, %45 : vector<64x256xf32>
    %50 = arith.addf %40, %49 : vector<64x256xf32>
    %c1_i32 = arith.constant 1 : i32
    %51 = tpu.dynamic_rotate %21 by %c1_i32 dim 0 : vector<64x256xf32>, i32 -> vector<64x256xf32>
    %c3 = arith.constant 3 : index
    %c0_25 = arith.constant 0 : index
    %c0_26 = arith.constant 0 : index
    %52 = vector.load %arg6[%c3, %c0_25, %c0_26] : memref<9x1x256xf32, #tpu.memory_space<vmem>>, vector<1x1x256xf32>
    %53 = vector.shape_cast %52 : vector<1x1x256xf32> to vector<1x256xf32>
    %54 = vector.broadcast %53 : vector<1x256xf32> to vector<64x256xf32>
    %55 = arith.mulf %54, %51 : vector<64x256xf32>
    %c3_27 = arith.constant 3 : index
    %c0_28 = arith.constant 0 : index
    %c0_29 = arith.constant 0 : index
    %56 = vector.load %arg7[%c3_27, %c0_28, %c0_29] : memref<9x64x1xf32, #tpu.memory_space<vmem>>, vector<1x64x1xf32>
    %57 = vector.shape_cast %56 : vector<1x64x1xf32> to vector<64x1xf32>
    %58 = vector.broadcast %57 : vector<64x1xf32> to vector<64x256xf32>
    %59 = arith.mulf %58, %55 : vector<64x256xf32>
    %60 = arith.addf %50, %59 : vector<64x256xf32>
    %c4 = arith.constant 4 : index
    %c0_30 = arith.constant 0 : index
    %c0_31 = arith.constant 0 : index
    %61 = vector.load %arg6[%c4, %c0_30, %c0_31] : memref<9x1x256xf32, #tpu.memory_space<vmem>>, vector<1x1x256xf32>
    %62 = vector.shape_cast %61 : vector<1x1x256xf32> to vector<1x256xf32>
    %63 = vector.broadcast %62 : vector<1x256xf32> to vector<64x256xf32>
    %64 = arith.mulf %63, %21 : vector<64x256xf32>
    %65 = arith.addf %60, %64 : vector<64x256xf32>
    %c63_i32 = arith.constant 63 : i32
    %66 = tpu.dynamic_rotate %21 by %c63_i32 dim 0 : vector<64x256xf32>, i32 -> vector<64x256xf32>
    %c5 = arith.constant 5 : index
    %c0_32 = arith.constant 0 : index
    %c0_33 = arith.constant 0 : index
    %67 = vector.load %arg6[%c5, %c0_32, %c0_33] : memref<9x1x256xf32, #tpu.memory_space<vmem>>, vector<1x1x256xf32>
    %68 = vector.shape_cast %67 : vector<1x1x256xf32> to vector<1x256xf32>
    %69 = vector.broadcast %68 : vector<1x256xf32> to vector<64x256xf32>
    %70 = arith.mulf %69, %66 : vector<64x256xf32>
    %c5_34 = arith.constant 5 : index
    %c0_35 = arith.constant 0 : index
    %c0_36 = arith.constant 0 : index
    %71 = vector.load %arg7[%c5_34, %c0_35, %c0_36] : memref<9x64x1xf32, #tpu.memory_space<vmem>>, vector<1x64x1xf32>
    %72 = vector.shape_cast %71 : vector<1x64x1xf32> to vector<64x1xf32>
    %73 = vector.broadcast %72 : vector<64x1xf32> to vector<64x256xf32>
    %74 = arith.mulf %73, %70 : vector<64x256xf32>
    %75 = arith.addf %65, %74 : vector<64x256xf32>
    %c57_i32 = arith.constant 57 : i32
    %76 = tpu.dynamic_rotate %21 by %c57_i32 dim 0 : vector<64x256xf32>, i32 -> vector<64x256xf32>
    %c6 = arith.constant 6 : index
    %c0_37 = arith.constant 0 : index
    %c0_38 = arith.constant 0 : index
    %77 = vector.load %arg6[%c6, %c0_37, %c0_38] : memref<9x1x256xf32, #tpu.memory_space<vmem>>, vector<1x1x256xf32>
    %78 = vector.shape_cast %77 : vector<1x1x256xf32> to vector<1x256xf32>
    %79 = vector.broadcast %78 : vector<1x256xf32> to vector<64x256xf32>
    %80 = arith.mulf %79, %76 : vector<64x256xf32>
    %c6_39 = arith.constant 6 : index
    %c0_40 = arith.constant 0 : index
    %c0_41 = arith.constant 0 : index
    %81 = vector.load %arg7[%c6_39, %c0_40, %c0_41] : memref<9x64x1xf32, #tpu.memory_space<vmem>>, vector<1x64x1xf32>
    %82 = vector.shape_cast %81 : vector<1x64x1xf32> to vector<64x1xf32>
    %83 = vector.broadcast %82 : vector<64x1xf32> to vector<64x256xf32>
    %84 = arith.mulf %83, %80 : vector<64x256xf32>
    %85 = arith.addf %75, %84 : vector<64x256xf32>
    %c56_i32 = arith.constant 56 : i32
    %86 = tpu.dynamic_rotate %21 by %c56_i32 dim 0 : vector<64x256xf32>, i32 -> vector<64x256xf32>
    %c7 = arith.constant 7 : index
    %c0_42 = arith.constant 0 : index
    %c0_43 = arith.constant 0 : index
    %87 = vector.load %arg6[%c7, %c0_42, %c0_43] : memref<9x1x256xf32, #tpu.memory_space<vmem>>, vector<1x1x256xf32>
    %88 = vector.shape_cast %87 : vector<1x1x256xf32> to vector<1x256xf32>
    %89 = vector.broadcast %88 : vector<1x256xf32> to vector<64x256xf32>
    %90 = arith.mulf %89, %86 : vector<64x256xf32>
    %c7_44 = arith.constant 7 : index
    %c0_45 = arith.constant 0 : index
    %c0_46 = arith.constant 0 : index
    %91 = vector.load %arg7[%c7_44, %c0_45, %c0_46] : memref<9x64x1xf32, #tpu.memory_space<vmem>>, vector<1x64x1xf32>
    %92 = vector.shape_cast %91 : vector<1x64x1xf32> to vector<64x1xf32>
    %93 = vector.broadcast %92 : vector<64x1xf32> to vector<64x256xf32>
    %94 = arith.mulf %93, %90 : vector<64x256xf32>
    %95 = arith.addf %85, %94 : vector<64x256xf32>
    %c55_i32 = arith.constant 55 : i32
    %96 = tpu.dynamic_rotate %21 by %c55_i32 dim 0 : vector<64x256xf32>, i32 -> vector<64x256xf32>
    %c8 = arith.constant 8 : index
    %c0_47 = arith.constant 0 : index
    %c0_48 = arith.constant 0 : index
    %97 = vector.load %arg6[%c8, %c0_47, %c0_48] : memref<9x1x256xf32, #tpu.memory_space<vmem>>, vector<1x1x256xf32>
    %98 = vector.shape_cast %97 : vector<1x1x256xf32> to vector<1x256xf32>
    %99 = vector.broadcast %98 : vector<1x256xf32> to vector<64x256xf32>
    %100 = arith.mulf %99, %96 : vector<64x256xf32>
    %c8_49 = arith.constant 8 : index
    %c0_50 = arith.constant 0 : index
    %c0_51 = arith.constant 0 : index
    %101 = vector.load %arg7[%c8_49, %c0_50, %c0_51] : memref<9x64x1xf32, #tpu.memory_space<vmem>>, vector<1x64x1xf32>
    %102 = vector.shape_cast %101 : vector<1x64x1xf32> to vector<64x1xf32>
    %103 = vector.broadcast %102 : vector<64x1xf32> to vector<64x256xf32>
    %104 = arith.mulf %103, %100 : vector<64x256xf32>
    %105 = arith.addf %95, %104 : vector<64x256xf32>
    %106 = vector.shape_cast %21 : vector<64x256xf32> to vector<1x64x256xf32>
    %cst_52 = arith.constant dense<0.000000e+00> : vector<1x256xf32>
    %107 = vector.multi_reduction <add>, %106, %cst_52 [1] : vector<1x64x256xf32> to vector<1x256xf32>
    %108 = vector.shape_cast %107 : vector<1x256xf32> to vector<1x1x256xf32>
    %109 = vector.shape_cast %105 : vector<64x256xf32> to vector<1x64x256xf32>
    %110 = vector.broadcast %108 : vector<1x1x256xf32> to vector<1x64x256xf32>
    %111 = arith.addf %109, %110 : vector<1x64x256xf32>
    %112 = vector.extract_strided_slice %111 {offsets = [0, 0, 0], sizes = [1, 64, 128], strides = [1, 1, 1]} : vector<1x64x256xf32> to vector<1x64x128xf32>
    %113 = vector.extract_strided_slice %111 {offsets = [0, 0, 128], sizes = [1, 64, 128], strides = [1, 1, 1]} : vector<1x64x256xf32> to vector<1x64x128xf32>
    %114 = arith.negf %7 : vector<64x128xf32>
    %115 = math.exp %114 : vector<64x128xf32>
    %cst_53 = arith.constant 1.000000e+00 : f32
    %116 = vector.broadcast %cst_53 : f32 to vector<64x128xf32>
    %117 = arith.addf %116, %115 : vector<64x128xf32>
    %118 = arith.divf %116, %117 : vector<64x128xf32>
    %119 = vector.shape_cast %118 : vector<64x128xf32> to vector<1x64x128xf32>
    %120 = arith.mulf %119, %112 : vector<1x64x128xf32>
    %121 = tpu.reciprocal %113 {approx = true} : vector<1x64x128xf32> -> vector<1x64x128xf32>
    %122 = arith.mulf %120, %121 : vector<1x64x128xf32>
    %123 = vector.shape_cast %122 : vector<1x64x128xf32> to vector<64x128xf32>
    %124 = arith.truncf %123 : vector<64x128xf32> to vector<64x128xbf16>
    %c0_54 = arith.constant 0 : index
    %c0_55 = arith.constant 0 : index
    %125 = vector.load %arg4[%c0_54, %c0_55] : memref<128x128xbf16, #tpu.memory_space<vmem>>, vector<128x128xbf16>
    %cst_56 = arith.constant dense<0.000000e+00> : vector<64x128xf32>
    %126 = tpu.matmul %124, %125, %cst_56 {dimension_numbers = #tpu.dot_dimension_numbers<[1], [0], [0], [1], [0, 0, 1, 1], [], []>} : vector<64x128xbf16>, vector<128x128xbf16>, vector<64x128xf32> -> vector<64x128xf32>
    %c0_57 = arith.constant 0 : index
    %c0_58 = arith.constant 0 : index
    %127 = vector.load %arg5[%c0_57, %c0_58] : memref<1x128xf32, #tpu.memory_space<vmem>>, vector<1x128xf32>
    %128 = vector.broadcast %127 : vector<1x128xf32> to vector<64x128xf32>
    %129 = arith.addf %126, %128 : vector<64x128xf32>
    %130 = vector.shape_cast %129 : vector<64x128xf32> to vector<1x64x128xf32>
    %131 = arith.truncf %130 : vector<1x64x128xf32> to vector<1x64x128xbf16>
    %c0_59 = arith.constant 0 : index
    %c0_60 = arith.constant 0 : index
    %c0_61 = arith.constant 0 : index
    %132 = vector.load %arg9[%c0_59, %c0_60, %c0_61] : memref<1x64x128xbf16, #tpu.memory_space<vmem>>, vector<1x64x128xbf16>
    tpu.vector_store %arg9[%c0_59, %c0_60, %c0_61], %131 {strides = array<i32>} : memref<1x64x128xbf16, #tpu.memory_space<vmem>>, vector<1x64x128xbf16>,
    return
  }
  func.func @transform_0(%arg0: i32) -> (i32, i32, i32) {
    %c0_i32 = arith.constant 0 : i32
    %c0_i32_0 = arith.constant 0 : i32
    %c0_i32_1 = arith.constant 0 : i32
    return %arg0, %c0_i32, %c0_i32_0 : i32, i32, i32
  }
  func.func @transform_1(%arg0: i32) -> (i32, i32) {
    %c0_i32 = arith.constant 0 : i32
    %c0_i32_0 = arith.constant 0 : i32
    %c0_i32_1 = arith.constant 0 : i32
    return %c0_i32, %c0_i32_0 : i32, i32
  }
  func.func @transform_2(%arg0: i32) -> (i32, i32) {
    %c0_i32 = arith.constant 0 : i32
    %c0_i32_0 = arith.constant 0 : i32
    %c0_i32_1 = arith.constant 0 : i32
    return %c0_i32, %c0_i32_0 : i32, i32
  }
  func.func @transform_3(%arg0: i32) -> (i32, i32) {
    %c0_i32 = arith.constant 0 : i32
    %c0_i32_0 = arith.constant 0 : i32
    %c0_i32_1 = arith.constant 0 : i32
    return %c0_i32, %c0_i32_0 : i32, i32
  }
  func.func @transform_4(%arg0: i32) -> (i32, i32) {
    %c0_i32 = arith.constant 0 : i32
    %c0_i32_0 = arith.constant 0 : i32
    %c0_i32_1 = arith.constant 0 : i32
    return %c0_i32, %c0_i32_0 : i32, i32
  }
  func.func @transform_5(%arg0: i32) -> (i32, i32, i32) {
    %c0_i32 = arith.constant 0 : i32
    %c0_i32_0 = arith.constant 0 : i32
    %c0_i32_1 = arith.constant 0 : i32
    %c0_i32_2 = arith.constant 0 : i32
    return %c0_i32, %c0_i32_0, %c0_i32_1 : i32, i32, i32
  }
  func.func @transform_6(%arg0: i32) -> (i32, i32, i32) {
    %c0_i32 = arith.constant 0 : i32
    %c0_i32_0 = arith.constant 0 : i32
    %c0_i32_1 = arith.constant 0 : i32
    %c0_i32_2 = arith.constant 0 : i32
    return %c0_i32, %c0_i32_0, %c0_i32_1 : i32, i32, i32
  }
  func.func @transform_7(%arg0: i32) -> (i32, i32) {
    %c0_i32 = arith.constant 0 : i32
    %c0_i32_0 = arith.constant 0 : i32
    %c0_i32_1 = arith.constant 0 : i32
    return %c0_i32, %c0_i32_0 : i32, i32
  }
  func.func @transform_8(%arg0: i32) -> (i32, i32, i32) {
    %c0_i32 = arith.constant 0 : i32
    %c0_i32_0 = arith.constant 0 : i32
    %c0_i32_1 = arith.constant 0 : i32
    return %arg0, %c0_i32, %c0_i32_0 : i32, i32, i32
  }
}

</mosaic_0001>

<bundles_post_ra>
// kernel: tpu_custom_call.1
= control target key start
LH: loop header
LB: loop body
LE: loop exit
PB: predicated region body
PF: predicated region fallthrough
CT: control target
= control target key end

     0   :  { %13 = vsyncpa [#allocation3], 0  ;;  %s4246_s0 = inlined_call_operand.vmem [shape: bf16[2,64,128], index: 0, kind: input, shape index: {}]   ;;  %s4247_s1 = inlined_call_operand.vmem [shape: bf16[128,384], index: 1, kind: input, shape index: {}]   ;;  %s4248_s2 = inlined_call_operand.vmem [shape: f32[1,384], index: 2, kind: input, shape index: {}]   ;;  %s4249_s3 = inlined_call_operand.vmem [shape: bf16[128,128], index: 3, kind: input, shape index: {}]   ;;  %s4250_s4 = inlined_call_operand.vmem [shape: f32[1,128], index: 4, kind: input, shape index: {}]   ;;  %s4251_s5 = inlined_call_operand.vmem [shape: f32[9,1,256], index: 5, kind: input, shape index: {}]   ;;  %s4252_s6 = inlined_call_operand.vmem [shape: f32[9,64,1], index: 6, kind: input, shape index: {}]   ;;  %s4253_s7 = inlined_call_operand.vmem [shape: f32[64,1], index: 7, kind: input, shape index: {}]   ;;  %s4254_s8 = inlined_call_operand.hbm [shape: bf16[2,64,128], index: 8, kind: output, shape index: {}]  }
   0x1   :  { %15 = vsyncpa [#allocation3 + $0x1], 0  ;;  %s2619_s27 = smov 0   ;;  %s2621_s28 = smov 0  }
   0x2   :  { %s2623_s29 = smov 0   ;;  %s2625_s30 = smov 0  }
   0x3 LB: > { %s2640_s9 = sadd.s32 4294967295, %s2568_s30   ;;  %s2106_s10 = sadd.s32 4294967294, %s2568_s30   ;;  %s2568_s30 = sphi %s2625_s30, %s4673_s30   ;;  %s2564_s29 = sphi %s2623_s29, %s4672_s29   ;;  %s2560_s28 = sphi %s2621_s28, %s4671_s28   ;;  %s2556_s27 = sphi %s2619_s27, %s4670_s27  }
   0x4   : > { %s2644_s11 = sadd.s32 1, %s2568_s30   ;;  %s201_s12 = sadd.s32 1, %s2564_s29 }
   0x5   : > { %s198_s13 = ssub.s32 %s2568_s30, %s2644_s11  ;;  %p211_p0 = scmp.ne.s32.totalorder %s2564_s29, %s2560_s28 }
   0x6   : > { %p199_p1 = scmp.eq.s32.totalorder %s198_s13, 0  ;;  %p212_p2 = scmp.eq.s32.totalorder %s2640_s9, 1 }
   0x7   : > { %p217_p3 = scmp.ne.s32.totalorder %s2560_s28, %s2556_s27  ;;  %p218_p4 = scmp.eq.s32.totalorder %s2106_s10, 1 }
   0x8   : > { %s2655_s14 = scalar_select %p199_p1, %s2564_s29, %s201_s12  }
   0x9   : > { %p2657_p5 = por %p212_p2, %p211_p0  ;;  %p2661_p6 = por %p218_p4, %p217_p3 }
   0xa   : > { %p2109_p7 = scmp.ge.s32.totalorder %s2568_s30, 1  ;;  %p265_p8 = scmp.lt.s32.totalorder %s2568_s30, 3 }
   0xc   : > { %p266_p9 = pnand %p2109_p7, %p265_p8 }
   0xe   : > { %269 = sbr.rel (%p266_p9) target bundleno = 686 (0x2ae), region = 52 }
  0x13   : > { %v699_v0 = vld [vmem:[%s4253_s7 + $0x10] sm:$0xff]  ;;  %v697_v1 = vld [vmem:[%s4253_s7] sm:$0xff]  ;;  %v2570_v2 = vmov 0   ;;  %v2400_v3 = vld [vmem:[%s4247_s1 + $0xac] ss:$12 sps:$4 sm:$0xff]   ;;  %p299_p10 = scmp.lt.s32.totalorder %s2640_s9, 1 }
  0x14   : > { %2399 = vset.pattern.permute.xlu1 %v2570_v2  ;;  %2398 = vset.pattern.permute.xlu0 %v2570_v2  ;;  %v2402_v4 = vld [vmem:[%s4247_s1 + $0xa8] ss:$12 sps:$4 sm:$0xff]   ;;  %v700_v5 = vld [vmem:[%s4253_s7 + $0x18] sm:$0xff]  ;;  %v701_v11 = vld [vmem:[%s4253_s7 + $0x20] sm:$0xff]  ;;  %s296_s23 = sand.u32 1, %s2560_s28   ;;  %s2244_s12 = sshll.u32 %s2640_s9, 9 }
  0x15   : > { %717 = vperm.xlu1 %2399, %v699_v0   ;;  %707 = vperm.xlu0 %2398, %v697_v1   ;;  %v698_v6 = vld [vmem:[%s4253_s7 + $0x8] sm:$0xff]  ;;  %v2403_v7 = vld [vmem:[%s4247_s1 + $0x94] ss:$12 sps:$4 sm:$0xff]   ;;  %v2405_v8 = vld [vmem:[%s4247_s1 + $0x90] ss:$12 sps:$4 sm:$0xff]   ;;  %s300_s26 = scalar_select %p299_p10, %s2640_s9, 1 }
  0x16   : > { %514 = vmatprep.subr.bf16.mxu0 %v2400_v3  ;;  %546 = vmatprep.mubr.bf16.mxu0 %v2570_v2  ;;  %v2406_v9 = vld [vmem:[%s4247_s1 + $0x7c] ss:$12 sps:$4 sm:$0xff]   ;;  %v703_v10 = vld [vmem:[%s4253_s7 + $0x30] sm:$0xff]  ;;  %v2408_v12 = vld [vmem:[%s4247_s1 + $0x78] ss:$12 sps:$4 sm:$0xff]   ;;  %s4202_s19 = scalar_lea.hbm %s4254_s8, %s2244_s12  ;;  %s2571_s20 = smov [#allocation2]  }
  0x17   : > { %515 = vmatpush1.bf16.msra.mxu0 %v2402_v4  ;;  %v2409_v13 = vld [vmem:[%s4247_s1 + $0x64] ss:$12 sps:$4 sm:$0xff]   ;;  %v702_v14 = vld [vmem:[%s4253_s7 + $0x28] sm:$0xff]  ;;  %v704_v15 = vld [vmem:[%s4253_s7 + $0x38] sm:$0xff]  ;;  %s2235_s22 = sshll.u32 %s300_s26, 5  ;;  %s4206_s26 = scalar_lea.sflag [#allocation3], %s296_s23 }
  0x18   : > { %516 = vmatprep.subr.bf16.mxu0 %v2403_v7  ;;  %v2411_v16 = vld [vmem:[%s4247_s1 + $0x60] ss:$12 sps:$4 sm:$0xff]   ;;  %s2726_s17 = scalar_lea.vmem %s4246_s0, %s2235_s22  ;;  %v2414_v20 = vld [vmem:[%s4247_s1 + $0x48] ss:$12 sps:$4 sm:$0xff]   ;;  %v2417_v25 = vld [vmem:[%s4247_s1 + $0x30] ss:$12 sps:$4 sm:$0xff]  }
  0x19   : > { %722 = vperm.xlu1 %2399, %v700_v5   ;;  %712 = vperm.xlu0 %2398, %v698_v6   ;;  %v2412_v17 = vld [vmem:[%s4247_s1 + $0x4c] ss:$12 sps:$4 sm:$0xff]   ;;  %v824_v19 = vld [vmem:[%s4252_s6] sm:$0xff]  ;;  %v2418_v26 = vld [vmem:[%s4247_s1 + $0x1c] ss:$12 sps:$4 sm:$0xff]   ;;  %s2512_s21 = sshll.u32 %s2571_s20, 4  ;;  %s2513_s21 = int_to_ptr.vmem [resolvable:$false] %s2512_s21 }
  0x1a   : > { %v825_v18 = vld [vmem:[%s4252_s6 + $0x8] sm:$0xff]  ;;  %v2415_v21 = vld [vmem:[%s4247_s1 + $0x34] ss:$12 sps:$4 sm:$0xff]   ;;  %v2427_v29 = vld [vmem:[%s4247_s1 + $0xb0] ss:$12 sps:$4 sm:$0xff]   ;;  %s2514_s24 = scalar_lea.vmem %s2513_s21, 1024 }
  0x1b   : > { %517 = vmatpush1.bf16.msra.mxu0 %v2405_v8  ;;  %v2424_v22 = vld [vmem:[%s2726_s17] sm:$0xff]   ;;  %v829_v23 = vld [vmem:[%s4252_s6 + $0x28] sm:$0xff]  ;;  %2292 = vmatprep.subr.bf16.mxu1 %v2427_v29  ;;  %v827_v37 = vld [vmem:[%s4252_s6 + $0x18] sm:$0xff] }
  0x1c   : > { %518 = vmatprep.subr.bf16.mxu0 %v2406_v9  ;;  %v828_v24 = vld [vmem:[%s4252_s6 + $0x20] sm:$0xff]  ;;  %2308 = vmatprep.mubr.bf16.mxu1 %v2424_v22  ;;  %v2143_v27 = vld [vmem:[%s4252_s6 + $0x48] sm:$0xff]  ;;  %v826_v38 = vld [vmem:[%s4252_s6 + $0x10] sm:$0xff] }
  0x1d   : > { %737 = vperm.xlu1 %2399, %v703_v10   ;;  %727 = vperm.xlu0 %2398, %v701_v11   ;;  %v2142_v28 = vld [vmem:[%s4252_s6 + $0x40] sm:$0xff]  ;;  %v2147_v32 = vld [vmem:[%s4252_s6 + $0x68] sm:$0xff]  ;;  %v831_v40 = vld [vmem:[%s4252_s6 + $0x38] sm:$0xff] }
  0x1e   : > { %v2420_v30 = vld [vmem:[%s4247_s1 + $0x18] ss:$12 sps:$4 sm:$0xff]   ;;  %2293 = vmatpush3.bf16.msra.mxu1 %v2427_v29  ;;  %v2423_v35 = vld [vmem:[%s4247_s1] ss:$12 sps:$4 sm:$0xff]   ;;  %v2431_v39 = vld [vmem:[%s4247_s1 + $0x68] ss:$12 sps:$4 sm:$0xff]  }
  0x1f   : > { %519 = vmatpush1.bf16.msra.mxu0 %v2408_v12  ;;  %v2421_v31 = vld [vmem:[%s4247_s1 + $0x4] ss:$12 sps:$4 sm:$0xff]   ;;  %v2430_v36 = vld [vmem:[%s4247_s1 + $0x80] ss:$12 sps:$4 sm:$0xff]   ;;  %v2145_v43 = vld [vmem:[%s4252_s6 + $0x58] sm:$0xff] }
  0x20   : > { %520 = vmatprep.subr.bf16.mxu0 %v2409_v13  ;;  %v2429_v33 = vld [vmem:[%s4247_s1 + $0x98] ss:$12 sps:$4 sm:$0xff]   ;;  %v830_v41 = vld [vmem:[%s4252_s6 + $0x30] sm:$0xff]  ;;  %v2425_v45 = vld [vmem:[%s2726_s17 + $0x8] sm:$0xff]  }
  0x21   : > { %732 = vperm.xlu1 %2399, %v702_v14   ;;  %742 = vperm.xlu0 %2398, %v704_v15   ;;  %v2146_v34 = vld [vmem:[%s4252_s6 + $0x60] sm:$0xff]  ;;  %v2432_v42 = vld [vmem:[%s4247_s1 + $0x50] ss:$12 sps:$4 sm:$0xff]   ;;  %v2152_v50 = vld [vmem:[%s4252_s6 + $0x88] sm:$0xff] }
  0x22   : > { %2294 = vmatprep.subr.bf16.mxu1 %v2429_v33  ;;  %v2144_v44 = vld [vmem:[%s4252_s6 + $0x50] sm:$0xff]  ;;  %v2433_v46 = vld [vmem:[%s4247_s1 + $0x38] ss:$12 sps:$4 sm:$0xff]   ;;  %v2434_v49 = vld [vmem:[%s4247_s1 + $0x20] ss:$12 sps:$4 sm:$0xff]  }
  0x23   : > { %521 = vmatpush1.bf16.msra.mxu0 %v2411_v16  ;;  %2295 = vmatpush3.bf16.msra.mxu1 %v2429_v33  ;;  %v2149_v47 = vld [vmem:[%s4252_s6 + $0x78] sm:$0xff]  ;;  %v2148_v48 = vld [vmem:[%s4252_s6 + $0x70] sm:$0xff]  ;;  %v2151_v51 = vld [vmem:[%s4252_s6 + $0x80] sm:$0xff] }
  0x24   : > { %522 = vmatprep.subr.bf16.mxu0 %v2412_v17  ;;  %2296 = vmatprep.subr.bf16.mxu1 %v2430_v36  ;;  %v2426_v52 = vld [vmem:[%s2726_s17 + $0x10] sm:$0xff]   ;;  %v2156_v54 = vld [vmem:[%s4252_s6 + $0xa8] sm:$0xff]  ;;  %v2155_v55 = vld [vmem:[%s4252_s6 + $0xa0] sm:$0xff] }
  0x25   : > { %839 = vperm.xlu1 %2399, %v825_v18   ;;  %834 = vperm.xlu0 %2398, %v824_v19   ;;  %v2435_v53 = vld [vmem:[%s4247_s1 + $0x8] ss:$12 sps:$4 sm:$0xff]   ;;  %v2154_v56 = vld [vmem:[%s4252_s6 + $0x98] sm:$0xff]  ;;  %v2160_v62 = vld [vmem:[%s4252_s6 + $0xc0] sm:$0xff] }
  0x26   : > { %v2153_v57 = vld [vmem:[%s4252_s6 + $0x90] sm:$0xff]  ;;  %v2428_v58 = vld [vmem:[%s2726_s17 + $0x18] sm:$0xff]   ;;  %v2161_v61 = vld [vmem:[%s4252_s6 + $0xc8] sm:$0xff]  ;;  %s2110_s17 = sshll.u32 %s296_s23, 5 }
  0x27   : > { %523 = vmatpush1.bf16.msra.mxu0 %v2414_v20  ;;  %2297 = vmatpush3.bf16.msra.mxu1 %v2430_v36  ;;  %v2158_v59 = vld [vmem:[%s4252_s6 + $0xb8] sm:$0xff]  ;;  %v2157_v60 = vld [vmem:[%s4252_s6 + $0xb0] sm:$0xff]  ;;  %v2165_v63 = vld [vmem:[%s4252_s6 + $0xe8] sm:$0xff]  ;;  %s298_s22 = scalar_lea.vmem [#allocation2], %s2110_s17 }
  0x28   : > { %524 = vmatprep.subr.bf16.mxu0 %v2415_v21  ;;  %2298 = vmatprep.subr.bf16.mxu1 %v2431_v39  ;;  %v2164_v0 = vld [vmem:[%s4252_s6 + $0xe0] sm:$0xff]  ;;  %v2163_v1 = vld [vmem:[%s4252_s6 + $0xd8] sm:$0xff]  ;;  %v2166_v4 = vld [vmem:[%s4252_s6 + $0xf0] sm:$0xff]  ;;  %s2044_s10 = sshll.u32 %s298_s22, 4  ;;  %s4197_s10 = int_to_ptr.vmem [resolvable:$true] %s2044_s10 }
  0x29   : > { %859 = vperm.xlu1 %2399, %v829_v23   ;;  %854 = vperm.xlu0 %2398, %v828_v24   ;;  %v2167_v3 = vld [vmem:[%s4252_s6 + $0xf8] sm:$0xff]  ;;  %v2171_v5 = vld [vmem:[%s4252_s6 + $0x148] sm:$0xff]  ;;  %v2170_v6 = vld [vmem:[%s4252_s6 + $0x140] sm:$0xff]  ;;  %s2508_s9 = scalar_lea.vmem %s4197_s10, 512  ;;  %p2515_p0 = scmp.lt.s32.totalorder %s4197_s10, %s2513_s21 }
  0x2a   : > { %v2175_v7 = vld [vmem:[%s4252_s6 + $0x168] sm:$0xff]  ;;  %v2174_v8 = vld [vmem:[%s4252_s6 + $0x160] sm:$0xff]  ;;  %v2173_v9 = vld [vmem:[%s4252_s6 + $0x158] sm:$0xff]  ;;  %p2509_p11 = scmp.ne.s32.totalorder %s4197_s10, %s2508_s9  ;;  %p2516_p1 = scmp.lt.s32.totalorder %s2514_s24, %s2508_s9 }
  0x2b   : > { %525 = vmatpush1.bf16.msra.mxu0 %v2417_v25  ;;  %2299 = vmatpush3.bf16.msra.mxu1 %v2431_v39  ;;  %v2172_v10 = vld [vmem:[%s4252_s6 + $0x150] sm:$0xff]  ;;  %v2177_v11 = vld [vmem:[%s4252_s6 + $0x178] sm:$0xff]  ;;  %v2180_v13 = vld [vmem:[%s4252_s6 + $0x188] sm:$0xff] }
  0x2c   : > { %526 = vmatprep.subr.bf16.mxu0 %v2418_v26  ;;  %2300 = vmatprep.subr.bf16.mxu1 %v2432_v42  ;;  %v2176_v12 = vld [vmem:[%s4252_s6 + $0x170] sm:$0xff]  ;;  %v2179_v14 = vld [vmem:[%s4252_s6 + $0x180] sm:$0xff]  ;;  %v2184_v15 = vld [vmem:[%s4252_s6 + $0x1a8] sm:$0xff]  ;;  %p2510_p12 = pnand %p2509_p11, %p2657_p5  ;;  %p2517_p2 = por %p2516_p1, %p2515_p0 }
  0x2d   : > { %933 = vperm.xlu1 %2399, %v2143_v27   ;;  %928 = vperm.xlu0 %2398, %v2142_v28   ;;  %v2183_v16 = vld [vmem:[%s4252_s6 + $0x1a0] sm:$0xff]  ;;  %v2182_v17 = vld [vmem:[%s4252_s6 + $0x198] sm:$0xff]  ;;  %v2181_v18 = vld [vmem:[%s4252_s6 + $0x190] sm:$0xff] }
  0x2e   : > { %v2186_v19 = vld [vmem:[%s4252_s6 + $0x1b8] sm:$0xff]  ;;  %v2185_v20 = vld [vmem:[%s4252_s6 + $0x1b0] sm:$0xff]  ;;  %v2189_v21 = vld [vmem:[%s4252_s6 + $0x1c8] sm:$0xff]  ;;  %p2511_p13 = pneg %p2510_p12 }
  0x2f   : > { %527 = vmatpush1.bf16.msra.mxu0 %v2420_v30  ;;  %2301 = vmatpush3.bf16.msra.mxu1 %v2432_v42  ;;  %v2193_v23 = vld [vmem:[%s4252_s6 + $0x1e8] sm:$0xff]  ;;  %v2192_v24 = vld [vmem:[%s4252_s6 + $0x1e0] sm:$0xff]  ;;  %v2191_v25 = vld [vmem:[%s4252_s6 + $0x1d8] sm:$0xff] }
  0x30   : > { %528 = vmatprep.subr.bf16.mxu0 %v2421_v31  ;;  %2302 = vmatprep.subr.bf16.mxu1 %v2433_v46  ;;  %v2190_v26 = vld [vmem:[%s4252_s6 + $0x1d0] sm:$0xff]  ;;  %v2195_v27 = vld [vmem:[%s4252_s6 + $0x1f8] sm:$0xff]  ;;  %v2198_v29 = vld [vmem:[%s4252_s6 + $0x208] sm:$0xff]  ;;  %p2518_p3 = pnand %p2517_p2, %p2511_p13 }
  0x31   : > { %953 = vperm.xlu1 %2399, %v2147_v32   ;;  %948 = vperm.xlu0 %2398, %v2146_v34   ;;  %v2194_v28 = vld [vmem:[%s4252_s6 + $0x1f0] sm:$0xff]  ;;  %v2197_v30 = vld [vmem:[%s4252_s6 + $0x200] sm:$0xff]  ;;  %v2202_v31 = vld [vmem:[%s4252_s6 + $0x228] sm:$0xff] }
  0x32   : > { %v2201_v32 = vld [vmem:[%s4252_s6 + $0x220] sm:$0xff]  ;;  %v2200_v33 = vld [vmem:[%s4252_s6 + $0x218] sm:$0xff]  ;;  %v2199_v34 = vld [vmem:[%s4252_s6 + $0x210] sm:$0xff] }
  0x33   : > { %529 = vmatpush1.bf16.msra.mxu0 %v2423_v35  ;;  %2303 = vmatpush3.bf16.msra.mxu1 %v2433_v46  ;;  %v2204_v36 = vld [vmem:[%s4252_s6 + $0x238] sm:$0xff] }
  0x34   : > { %2304 = vmatprep.subr.bf16.mxu1 %v2434_v49 }
  0x35   : > { %849 = vperm.xlu1 %2399, %v827_v37   ;;  %844 = vperm.xlu0 %2398, %v826_v38   ;;  %v2203_v37 = vld [vmem:[%s4252_s6 + $0x230] sm:$0xff] }
  0x36   : > { %547 = vmatmul.mubr.bf16.vlgmr.msra.gmra.mxu0 %v2424_v22  ;;  %v2188_v22 = vld [vmem:[%s4252_s6 + $0x1c0] sm:$0xff] }
  0x37   : > { %556 = vmatprep.mubr.bf16.mxu0 %v2570_v2  ;;  %2305 = vmatpush3.bf16.msra.mxu1 %v2434_v49 }
  0x38   : > { %2306 = vmatprep.subr.bf16.mxu1 %v2435_v53 }
  0x39   : > { %869 = vperm.xlu1 %2399, %v831_v40   ;;  %864 = vperm.xlu0 %2398, %v830_v41  }
  0x3b   : > { %2307 = vmatpush3.bf16.msra.mxu1 %v2435_v53 }
  0x3d   : > { %943 = vperm.xlu1 %2399, %v2145_v43   ;;  %938 = vperm.xlu0 %2398, %v2144_v44  }
  0x3e   : > { %557 = vmatmul.mubr.bf16.gmra.mxu0 %v2425_v45  ;;  %2309 = vmatmul.mubr.bf16.vlgmr.msra.gmra.mxu1 %v2425_v45 }
  0x3f   : > { %566 = vmatprep.mubr.bf16.mxu0 %v2570_v2  ;;  %2312 = vmatprep.mubr.bf16.mxu1 %v2426_v52 }
  0x41   : > { %963 = vperm.xlu1 %2399, %v2149_v47   ;;  %958 = vperm.xlu0 %2398, %v2148_v48  }
  0x45   : > { %1076 = vperm.xlu1 %2399, %v2152_v50   ;;  %1071 = vperm.xlu0 %2398, %v2151_v51  }
  0x46   : > { %567 = vmatmul.mubr.bf16.gmra.mxu0 %v2426_v52  ;;  %2313 = vmatmul.mubr.bf16.gmra.mxu1 %v2428_v58 }
  0x47   : > { %576 = vmatprep.mubr.bf16.mxu0 %v2570_v2  ;;  %v2162_v2 = vld [vmem:[%s4252_s6 + $0xd0] sm:$0xff] }
  0x49   : > { %1096 = vperm.xlu1 %2399, %v2156_v54   ;;  %1091 = vperm.xlu0 %2398, %v2155_v55  }
  0x4d   : > { %1086 = vperm.xlu1 %2399, %v2154_v56   ;;  %1081 = vperm.xlu0 %2398, %v2153_v57  }
  0x4e   : > { %577 = vmatmul.mubr.bf16.gmra.mxu0 %v2428_v58 }
  0x51   : > { %1106 = vperm.xlu1 %2399, %v2158_v59   ;;  %1101 = vperm.xlu0 %2398, %v2157_v60  }
  0x55   : > { %1186 = vperm.xlu1 %2399, %v2161_v61   ;;  %1181 = vperm.xlu0 %2398, %v2160_v62  }
  0x59   : > { %1206 = vperm.xlu1 %2399, %v2165_v63   ;;  %1201 = vperm.xlu0 %2398, %v2164_v0  }
  0x5d   : > { %1196 = vperm.xlu1 %2399, %v2163_v1   ;;  %1191 = vperm.xlu0 %2398, %v2162_v2  }
  0x61   : > { %1216 = vperm.xlu1 %2399, %v2167_v3   ;;  %1211 = vperm.xlu0 %2398, %v2166_v4  }
  0x65   : > { %1341 = vperm.xlu1 %2399, %v2171_v5   ;;  %1336 = vperm.xlu0 %2398, %v2170_v6  }
  0x69   : > { %1361 = vperm.xlu1 %2399, %v2175_v7   ;;  %1356 = vperm.xlu0 %2398, %v2174_v8  }
  0x6d   : > { %1351 = vperm.xlu1 %2399, %v2173_v9   ;;  %1346 = vperm.xlu0 %2398, %v2172_v10  }
  0x71   : > { %1371 = vperm.xlu1 %2399, %v2177_v11   ;;  %1366 = vperm.xlu0 %2398, %v2176_v12  }
  0x75   : > { %1451 = vperm.xlu1 %2399, %v2180_v13   ;;  %1446 = vperm.xlu0 %2398, %v2179_v14  }
  0x79   : > { %1471 = vperm.xlu1 %2399, %v2184_v15   ;;  %1466 = vperm.xlu0 %2398, %v2183_v16  }
  0x7d   : > { %1461 = vperm.xlu1 %2399, %v2182_v17   ;;  %1456 = vperm.xlu0 %2398, %v2181_v18   ;;  %v347_v17 = vlaneseq }
  0x81   : > { %1481 = vperm.xlu1 %2399, %v2186_v19   ;;  %1476 = vperm.xlu0 %2398, %v2185_v20  }
  0x85   : > { %1561 = vperm.xlu1 %2399, %v2189_v21   ;;  %1556 = vperm.xlu0 %2398, %v2188_v22   ;;  %v3046_v21 = vshrl.u32 %v347_v17, 7 }
  0x87   : > { %4391 = vst [vmem:[#allocation42_spill] sm:$0xff] %v3046_v21  ;;  %vm779_vm0 = vcmp.lt.s32.totalorder %v3046_v21, 1  ;;  %vm1014_vm1 = vcmp.lt.s32.totalorder %v3046_v21, 7 }
  0x89   : > { %1581 = vperm.xlu1 %2399, %v2193_v23   ;;  %1576 = vperm.xlu0 %2398, %v2192_v24   ;;  %v3051_v24 = vsub.s32 1, %v3046_v21 }
  0x8d   : > { %1571 = vperm.xlu1 %2399, %v2191_v25   ;;  %1566 = vperm.xlu0 %2398, %v2190_v26  }
  0x90   : > { %v2966_v35 = vpop.permute.xlu1 %717  ;;  %v2974_v38 = vpop.permute.xlu0 %707 }
  0x91   : > { %1591 = vperm.xlu1 %2399, %v2195_v27   ;;  %1586 = vperm.xlu0 %2398, %v2194_v28   ;;  %4354 = vst [vmem:[#allocation5_spill] sm:$0xff] %v2966_v35  ;;  %4355 = vst [vmem:[#allocation6_spill] sm:$0xff] %v2974_v38  ;;  %v3058_v27 = vld [vmem:[%s4248_s2] sm:$0x7] }
  0x94   : > { %v2976_v39 = vpop.permute.xlu1 %722  ;;  %v2978_v40 = vpop.permute.xlu0 %712 }
  0x95   : > { %1671 = vperm.xlu1 %2399, %v2198_v29   ;;  %1666 = vperm.xlu0 %2398, %v2197_v30   ;;  %4356 = vst [vmem:[#allocation7_spill] sm:$0xff] %v2976_v39  ;;  %4357 = vst [vmem:[#allocation8_spill] sm:$0xff] %v2978_v40  ;;  %v354_v29 = vrot.slane %v3058_v27, %v3051_v24 }
  0x98   : > { %v2980_v41 = vpop.permute.xlu1 %737  ;;  %v2982_v42 = vpop.permute.xlu0 %727 }
  0x99   : > { %1691 = vperm.xlu1 %2399, %v2202_v31   ;;  %1686 = vperm.xlu0 %2398, %v2201_v32   ;;  %4358 = vst [vmem:[#allocation9_spill] sm:$0xff] %v2980_v41  ;;  %4359 = vst [vmem:[#allocation10_spill] sm:$0xff] %v2982_v42  ;;  %v3065_v31 = vsub.s32 0, %v3046_v21 }
  0x9c   : > { %v2984_v43 = vpop.permute.xlu1 %732  ;;  %v2986_v44 = vpop.permute.xlu0 %742 }
  0x9d   : > { %1681 = vperm.xlu1 %2399, %v2200_v33   ;;  %1676 = vperm.xlu0 %2398, %v2199_v34   ;;  %4360 = vst [vmem:[#allocation11_spill] sm:$0xff] %v2984_v43  ;;  %4361 = vst [vmem:[#allocation12_spill] sm:$0xff] %v2986_v44 }
  0xa0   : > { %v2988_v45 = vpop.permute.xlu1 %839  ;;  %v2990_v46 = vpop.permute.xlu0 %834 }
  0xa1   : > { %1701 = vperm.xlu1 %2399, %v2204_v36   ;;  %1696 = vperm.xlu0 %2398, %v2203_v37   ;;  %4362 = vst [vmem:[#allocation13_spill] sm:$0xff] %v2988_v45  ;;  %4363 = vst [vmem:[#allocation14_spill] sm:$0xff] %v2990_v46 }
  0xa4   : > { %v2992_v47 = vpop.permute.xlu1 %859  ;;  %v2994_v48 = vpop.permute.xlu0 %854 }
  0xa5   : > { %4364 = vst [vmem:[#allocation15_spill] sm:$0xff] %v2992_v47  ;;  %4365 = vst [vmem:[#allocation16_spill] sm:$0xff] %v2994_v48 }
  0xa8   : > { %v2996_v49 = vpop.permute.xlu1 %933  ;;  %v2998_v50 = vpop.permute.xlu0 %928 }
  0xa9   : > { %4366 = vst [vmem:[#allocation17_spill] sm:$0xff] %v2996_v49  ;;  %4367 = vst [vmem:[#allocation18_spill] sm:$0xff] %v2998_v50 }
  0xac   : > { %v3000_v51 = vpop.permute.xlu1 %953  ;;  %v3002_v52 = vpop.permute.xlu0 %948 }
  0xad   : > { %4368 = vst [vmem:[#allocation19_spill] sm:$0xff] %v3000_v51  ;;  %4369 = vst [vmem:[#allocation20_spill] sm:$0xff] %v3002_v52 }
  0xb0   : > { %v3004_v53 = vpop.permute.xlu1 %849  ;;  %v3006_v54 = vpop.permute.xlu0 %844 }
  0xb1   : > { %4370 = vst [vmem:[#allocation21_spill] sm:$0xff] %v3004_v53  ;;  %4371 = vst [vmem:[#allocation22_spill] sm:$0xff] %v3006_v54 }
  0xb4   : > { %v3008_v55 = vpop.permute.xlu1 %869  ;;  %v3010_v56 = vpop.permute.xlu0 %864 }
  0xb5   : > { %4372 = vst [vmem:[#allocation23_spill] sm:$0xff] %v3008_v55  ;;  %4373 = vst [vmem:[#allocation24_spill] sm:$0xff] %v3010_v56 }
  0xb8   : > { %v3012_v57 = vpop.permute.xlu1 %943  ;;  %v3014_v58 = vpop.permute.xlu0 %938 }
  0xb9   : > { %4374 = vst [vmem:[#allocation25_spill] sm:$0xff] %v3012_v57  ;;  %4375 = vst [vmem:[#allocation26_spill] sm:$0xff] %v3014_v58  ;;  %v2178_v58 = vld [vmem:[%s4251_s5 + $0xc] sm:$0x3] }
  0xbc   : > { %v3016_v59 = vpop.permute.xlu1 %963  ;;  %v3018_v60 = vpop.permute.xlu0 %958 }
  0xbd   : > { %4376 = vst [vmem:[#allocation27_spill] sm:$0xff] %v3016_v59  ;;  %4377 = vst [vmem:[#allocation28_spill] sm:$0xff] %v3018_v60  ;;  %v350_v60 = vrot.slane %v3058_v27, %v3065_v31 }
  0xc0   : > { %v3020_v61 = vpop.permute.xlu1 %1076  ;;  %v3022_v62 = vpop.permute.xlu0 %1071 }
  0xc1   : > { %4378 = vst [vmem:[#allocation29_spill] sm:$0xff] %v3020_v61  ;;  %4379 = vst [vmem:[#allocation30_spill] sm:$0xff] %v3022_v62 }
  0xc4   : > { %v3024_v63 = vpop.permute.xlu1 %1096  ;;  %v3026_v0 = vpop.permute.xlu0 %1091 }
  0xc5   : > { %4380 = vst [vmem:[#allocation31_spill] sm:$0xff] %v3024_v63  ;;  %4381 = vst [vmem:[#allocation32_spill] sm:$0xff] %v3026_v0 }
  0xc8   : > { %v3028_v1 = vpop.permute.xlu1 %1086  ;;  %v3030_v2 = vpop.permute.xlu0 %1081 }
  0xc9   : > { %4382 = vst [vmem:[#allocation33_spill] sm:$0xff] %v3028_v1  ;;  %4383 = vst [vmem:[#allocation34_spill] sm:$0xff] %v3030_v2 }
  0xcc   : > { %v3032_v4 = vpop.permute.xlu1 %1106  ;;  %v3034_v5 = vpop.permute.xlu0 %1101 }
  0xcd   : > { %4384 = vst [vmem:[#allocation35_spill] sm:$0xff] %v3032_v4  ;;  %4385 = vst [vmem:[#allocation36_spill] sm:$0xff] %v3034_v5 }
  0xd0   : > { %v3036_v8 = vpop.permute.xlu1 %1186  ;;  %v3038_v10 = vpop.permute.xlu0 %1181 }
  0xd1   : > { %4386 = vst [vmem:[#allocation37_spill] sm:$0xff] %v3036_v8  ;;  %4387 = vst [vmem:[#allocation38_spill] sm:$0xff] %v3038_v10 }
  0xd4   : > { %v3040_v13 = vpop.permute.xlu1 %1206  ;;  %v3042_v15 = vpop.permute.xlu0 %1201 }
  0xd5   : > { %4388 = vst [vmem:[#allocation39_spill] sm:$0xff] %v3040_v13  ;;  %4389 = vst [vmem:[#allocation40_spill] sm:$0xff] %v3042_v15 }
  0xd8   : > { %v3044_v19 = vpop.permute.xlu1 %1196  ;;  %v3048_v22 = vpop.permute.xlu0 %1191 }
  0xd9   : > { %4390 = vst [vmem:[#allocation41_spill] sm:$0xff] %v3044_v19  ;;  %4392 = vst [vmem:[#allocation43_spill] sm:$0xff] %v3048_v22  ;;  %v2169_v22 = vld [vmem:[%s4251_s5 + $0xa] sm:$0x3] }
  0xdc   : > { %v3053_v26 = vpop.permute.xlu1 %1216  ;;  %v3062_v30 = vpop.permute.xlu0 %1211 }
  0xdd   : > { %4393 = vst [vmem:[#allocation44_spill] sm:$0xff] %v3053_v26  ;;  %4394 = vst [vmem:[#allocation45_spill] sm:$0xff] %v3062_v30 }
  0xe0   : > { %v3075_v5 = vpop.permute.xlu1 %1341 }
  0xe1   : > { %4395 = vst [vmem:[#allocation46_spill] sm:$0xff] %v3075_v5 }
  0xe4   : > { %v3097_v4 = vpop.permute.xlu1 %1361 }
  0xe5   : > { %4397 = vst [vmem:[#allocation48_spill] sm:$0xff] %v3097_v4 }
  0xf6   : > { %v548_v3 = vpop.f32.mrf.mxu0 }
  0xf8   : > { %v550_v6 = vpop.f32.mrf.mxu0 }
  0xf9   : > { %v3079_v56 = vadd.f32 %v550_v6, %v354_v29 }
  0xfa   : > { %v552_v7 = vpop.f32.mrf.mxu0 }
  0xfb   : > { %v553_v61 = vadd.f32 %v552_v7, %v350_v60  ;;  %v2437_v7 = vld [vmem:[%s4249_s3 + $0x30] sm:$0xff]  }
  0xfc   : > { %v554_v9 = vpop.f32.mrf.mxu0 }
  0xfd   : > { %v3069_v36 = vadd.f32 %v554_v9, %v354_v29 }
  0xfe   : > { %v558_v11 = vpop.f32.mrf.mxu0 }
 0x100   : > { %v560_v12 = vpop.f32.mrf.mxu0 }
 0x101   : > { %v3081_v8 = vadd.f32 %v560_v12, %v354_v29  ;;  %v549_v12 = vadd.f32 %v548_v3, %v350_v60  ;;  %v2206_v3 = vmul.f32 -1.442695, %v553_v61  ;;  %v2438_v61 = vld [vmem:[%s4249_s3 + $0x28] sm:$0xff]  }
 0x102   : > { %v562_v14 = vpop.f32.mrf.mxu0 }
 0x103   : > { %v563_v59 = vadd.f32 %v562_v14, %v350_v60  ;;  %v2205_v45 = vmul.f32 -1.442695, %v549_v12 }
 0x104   : > { %v564_v16 = vpop.f32.mrf.mxu0 }
 0x105   : > { %v3083_v26 = vadd.f32 %v564_v16, %v354_v29  ;;  %v2208_v14 = vmul.f32 -1.442695, %v563_v59  ;;  %2444 = vpow2.f32 %v2205_v45  ;;  %v2439_v59 = vld [vmem:[%s4249_s3 + $0x20] sm:$0xff]  }
 0x106   : > { %v568_v18 = vpop.f32.mrf.mxu0  ;;  %2446 = vpow2.f32 %v2206_v3  ;;  %v2440_v3 = vld [vmem:[%s4249_s3 + $0x18] sm:$0xff]  }
 0x107   : > { %v569_v46 = vadd.f32 %v568_v18, %v350_v60 }
 0x108   : > { %v570_v20 = vpop.f32.mrf.mxu0 }
 0x109   : > { %v3071_v37 = vadd.f32 %v570_v20, %v354_v29  ;;  %v3089_v20 = vpop.permute.xlu0 %1336  ;;  %v2209_v18 = vmul.f32 -1.442695, %v569_v46 }
 0x10a   : > { %v572_v23 = vpop.f32.mrf.mxu0  ;;  %4396 = vst [vmem:[#allocation47_spill] sm:$0xff] %v3089_v20 }
 0x10c   : > { %v574_v25 = vpop.f32.mrf.mxu0 }
 0x10d   : > { %v3067_v33 = vadd.f32 %v574_v25, %v354_v29  ;;  %v3102_v62 = vpop.permute.xlu0 %1356 }
 0x10e   : > { %v578_v28 = vpop.f32.mrf.mxu0  ;;  %4398 = vst [vmem:[#allocation49_spill] sm:$0xff] %v3102_v62 }
 0x10f   : > { %v653_v9 = vmax.f32 %v3069_v36, %v3067_v33 }
 0x110   : > { %v580_v32 = vpop.f32.mrf.mxu0 }
 0x111   : > { %v3073_v17 = vadd.f32 %v580_v32, %v354_v29  ;;  %v652_v32 = vmax.f32 %v3079_v56, %v3071_v37  ;;  %v3114_v12 = vpop.permute.xlu0 %1346 }
 0x112   : > { %v582_v34 = vpop.f32.mrf.mxu0  ;;  %4400 = vst [vmem:[#allocation51_spill] sm:$0xff] %v3114_v12 }
 0x113   : > { %v654_v5 = vmax.f32 %v3081_v8, %v3073_v17  ;;  %v656_v10 = vmax.f32 %v652_v32, %v653_v9  ;;  %v579_v32 = vadd.f32 %v578_v28, %v350_v60 }
 0x114   : > { %v584_v30 = vpop.f32.mrf.mxu0 }
 0x115   : > { %v3087_v25 = vadd.f32 %v584_v30, %v354_v29  ;;  %v2436_v29 = vld [vmem:[%s4249_s3 + $0x38] sm:$0xff]   ;;  %v559_v30 = vadd.f32 %v558_v11, %v350_v60 }
 0x116   : > { %2316 = vmatprep.subr.bf16.mxu0 %v2436_v29  ;;  %2340 = vmatprep.subr.bf16.mxu1 %v2436_v29 }
 0x117   : > { %v655_v6 = vmax.f32 %v3083_v26, %v3087_v25  ;;  %2317 = vmatpush3.bf16.msra.mxu0 %v2436_v29  ;;  %2348 = vmatpush3.bf16.msra.mxu1 %v2436_v29  ;;  %v2207_v9 = vmul.f32 -1.442695, %v559_v30 }
 0x118   : > { %2318 = vmatprep.subr.bf16.mxu0 %v2437_v7  ;;  %2341 = vmatprep.subr.bf16.mxu1 %v2437_v7 }
 0x119   : > { %v657_v16 = vmax.f32 %v654_v5, %v655_v6  ;;  %v573_v5 = vadd.f32 %v572_v23, %v350_v60  ;;  %v3109_v6 = vpop.permute.xlu1 %1351  ;;  %2448 = vpow2.f32 %v2207_v9 }
 0x11a   : > { %4399 = vst [vmem:[#allocation50_spill] sm:$0xff] %v3109_v6  ;;  %2450 = vpow2.f32 %v2208_v14 }
 0x11b   : > { %v658_v20 = vmax.f32 %v656_v10, %v657_v16  ;;  %v3107_v10 = vpop.f32.mrf.mxu1  ;;  %v583_v16 = vadd.f32 %v582_v34, %v350_v60  ;;  %2319 = vmatpush3.bf16.msra.mxu0 %v2437_v7  ;;  %2349 = vmatpush3.bf16.msra.mxu1 %v2437_v7  ;;  %v2211_v60 = vmul.f32 -1.442695, %v579_v32  ;;  %2452 = vpow2.f32 %v2209_v18 }
 0x11c   : > { %2320 = vmatprep.subr.bf16.mxu0 %v2438_v61  ;;  %2342 = vmatprep.subr.bf16.mxu1 %v2438_v61 }
 0x11d   : > { %v659_v49 = vrot.slane %v658_v20, 4  ;;  %v3119_v34 = vpop.f32.mrf.mxu1  ;;  %v2212_v45 = vmul.f32 -1.442695, %v583_v16  ;;  %v2441_v16 = vld [vmem:[%s4249_s3 + $0x10] sm:$0xff]  }
 0x11f   : > { %v660_v11 = vmax.f32 %v658_v20, %v659_v49  ;;  %v2210_v49 = vmul.f32 -1.442695, %v573_v5  ;;  %2321 = vmatpush3.bf16.msra.mxu0 %v2438_v61  ;;  %2350 = vmatpush3.bf16.msra.mxu1 %v2438_v61  ;;  %v3121_v20 = vpop.permute.xlu1 %1371  ;;  %v3125_v30 = vpop.f32.mrf.mxu1 }
 0x120   : > { %4401 = vst [vmem:[#allocation52_spill] sm:$0xff] %v3121_v20  ;;  %2322 = vmatprep.subr.bf16.mxu0 %v2439_v59  ;;  %2343 = vmatprep.subr.bf16.mxu1 %v2439_v59  ;;  %v3130_v5 = vpop.permute.xlu0 %1366 }
 0x121   : > { %v661_v23 = vrot.slane %v660_v11, 2  ;;  %2454 = vpow2.f32 %v2210_v49  ;;  %4402 = vst [vmem:[#allocation53_spill] sm:$0xff] %v3130_v5 }
 0x122   : > { %2456 = vpow2.f32 %v2211_v60 }
 0x123   : > { %v662_v28 = vmax.f32 %v660_v11, %v661_v23  ;;  %2458 = vpow2.f32 %v2212_v45  ;;  %2323 = vmatpush3.bf16.msra.mxu0 %v2439_v59  ;;  %2351 = vmatpush3.bf16.msra.mxu1 %v2439_v59  ;;  %v3147_v23 = vpop.f32.mrf.mxu1  ;;  %v2445_v59 = vpop.eup %2444 }
 0x124   : > { %2324 = vmatprep.subr.bf16.mxu0 %v2440_v3  ;;  %2344 = vmatprep.subr.bf16.mxu1 %v2440_v3  ;;  %v3153_v60 = vpop.permute.xlu0 %1446  ;;  %v2447_v45 = vpop.eup %2446  ;;  %v1802_v5 = vadd.f32 1.0, %v2445_v59 }
 0x125   : > { %v663_v46 = vrot.slane %v662_v28, 1  ;;  %4404 = vst [vmem:[#allocation55_spill] sm:$0xff] %v3153_v60  ;;  %v1803_v59 = vadd.f32 1.0, %v2447_v45 }
 0x127   : > { %v3123_v29 = vmax.f32 %v662_v28, %v663_v46  ;;  %2325 = vmatpush3.bf16.msra.mxu0 %v2440_v3  ;;  %2352 = vmatpush3.bf16.msra.mxu1 %v2440_v3  ;;  %v2442_v28 = vld [vmem:[%s4249_s3 + $0x8] sm:$0xff]   ;;  %v2449_v3 = vpop.eup %2448 }
 0x128   : > { %2326 = vmatprep.subr.bf16.mxu0 %v2441_v16  ;;  %v2168_v46 = vld [vmem:[%s4251_s5 + $0x8] sm:$0x3]  ;;  %2345 = vmatprep.subr.bf16.mxu1 %v2441_v16  ;;  %v3202_v12 = vpop.permute.xlu0 %1466 }
 0x129   : > { %v665_v7 = vsub.f32 %v3079_v56, %v3123_v29  ;;  %v666_v9 = vsub.f32 %v3069_v36, %v3123_v29  ;;  %v667_v32 = vsub.f32 %v3081_v8, %v3123_v29  ;;  %v668_v11 = vsub.f32 %v3083_v26, %v3123_v29  ;;  %v3149_v8 = vpop.permute.xlu1 %1451  ;;  %4408 = vst [vmem:[#allocation59_spill] sm:$0xff] %v3202_v12 }
 0x12a   : > { %v671_v14 = vsub.f32 %v3073_v17, %v3123_v29  ;;  %v669_v36 = vsub.f32 %v3071_v37, %v3123_v29  ;;  %4403 = vst [vmem:[#allocation54_spill] sm:$0xff] %v3149_v8  ;;  %v670_v17 = vsub.f32 %v3067_v33, %v3123_v29  ;;  %v2141_v37 = vld [vmem:[%s4251_s5 + $0x2] sm:$0x3]  ;;  %v796_v33 = vld [vmem:[%s4251_s5] sm:$0x3]  ;;  %v3190_v8 = vrot.slane %v2168_v46, %v3051_v24 }
 0x12b   : > { %v673_v61 = vmul.f32 1.442695, %v665_v7  ;;  %v675_v56 = vmul.f32 1.442695, %v666_v9  ;;  %v677_v18 = vmul.f32 1.442695, %v667_v32  ;;  %v3167_v9 = vpop.f32.mrf.mxu1  ;;  %2327 = vmatpush3.bf16.msra.mxu0 %v2441_v16  ;;  %2353 = vmatpush3.bf16.msra.mxu1 %v2441_v16  ;;  %v3197_v20 = vrot.slane %v796_v33, %v3065_v31 }
 0x12c   : > { %v679_v26 = vmul.f32 1.442695, %v668_v11  ;;  %v685_v49 = vmul.f32 1.442695, %v671_v14  ;;  %v681_v7 = vmul.f32 1.442695, %v669_v36  ;;  %v2451_v14 = vpop.eup %2450  ;;  %2328 = vmatprep.subr.bf16.mxu0 %v2442_v28  ;;  %2346 = vmatprep.subr.bf16.mxu1 %v2442_v28 }
 0x12d   : > { %2460 = vpow2.f32 %v673_v61  ;;  %v2150_v32 = vld [vmem:[%s4251_s5 + $0x4] sm:$0x3]  ;;  %v683_v11 = vmul.f32 1.442695, %v670_v17  ;;  %v2159_v61 = vld [vmem:[%s4251_s5 + $0x6] sm:$0x3]  ;;  %v2453_v36 = vpop.eup %2452  ;;  %v637_v55 = vpop.f32.mrf.mxu1 }
 0x12e   : > { %2462 = vpow2.f32 %v675_v56  ;;  %v3176_v56 = vrot.slane %v2141_v37, %v3065_v31  ;;  %v2187_v17 = vld [vmem:[%s4251_s5 + $0xe] sm:$0x3]  ;;  %v2455_v60 = vpop.eup %2454  ;;  %4407 = vst [vmem:[#allocation58_spill] sm:$0xff] %v3197_v20  ;;  %v3200_v50 = vrot.slane %v2150_v32, %v3051_v24  ;;  %v1804_v16 = vadd.f32 1.0, %v2449_v3 }
 0x12f   : > { %2464 = vpow2.f32 %v677_v18  ;;  %v3179_v18 = vrot.slane %v2141_v37, %v3051_v24  ;;  %v2443_v37 = vld [vmem:[%s4249_s3] sm:$0xff]   ;;  %v2457_v2 = vpop.eup %2456  ;;  %v3208_v45 = vrot.slane %v2159_v61, %v3051_v24  ;;  %v1805_v20 = vadd.f32 1.0, %v2451_v14  ;;  %2329 = vmatpush3.bf16.msra.mxu0 %v2442_v28  ;;  %v2196_v14 = vld [vmem:[%s4251_s5 + $0x10] sm:$0x3]  ;;  %2354 = vmatpush3.bf16.msra.mxu1 %v2442_v28 }
 0x130   : > { %2466 = vpow2.f32 %v679_v26  ;;  %4405 = vst [vmem:[#allocation56_spill] sm:$0xff] %v3176_v56  ;;  %v3181_v26 = vpop.permute.xlu1 %1471  ;;  %v357_v56 = vsub.s32 2, %v3046_v21  ;;  %v3217_v54 = vrot.slane %v2150_v32, %v3065_v31  ;;  %v3220_v3 = vrot.slane %v2159_v61, %v3065_v31  ;;  %2330 = vmatprep.subr.bf16.mxu0 %v2443_v37  ;;  %2347 = vmatprep.subr.bf16.mxu1 %v2443_v37 }
 0x131   : > { %2468 = vpow2.f32 %v685_v49  ;;  %4406 = vst [vmem:[#allocation57_spill] sm:$0xff] %v3181_v26  ;;  %v3187_v49 = vrot.slane %v796_v33, %v3051_v24  ;;  %v3211_v33 = vrot.slane %v2168_v46, %v3065_v31  ;;  %v1806_v26 = vadd.f32 1.0, %v2453_v36  ;;  %v2315_v36 = vpop.f32.mrf.mxu1 }
 0x132   : > { %2470 = vpow2.f32 %v681_v7  ;;  %v2459_v7 = vpop.eup %2458  ;;  %4410 = vst [vmem:[#allocation61_spill] sm:$0xff] %v3217_v54  ;;  %4411 = vst [vmem:[#allocation62_spill] sm:$0xff] %v3220_v3  ;;  %v672_v46 = vsub.f32 %v3087_v25, %v3123_v29  ;;  %v358_v32 = vrot.slane %v3058_v27, %v357_v56  ;;  %v1807_v61 = vadd.f32 1.0, %v2455_v60 }
 0x133   : > { %2472 = vpow2.f32 %v683_v11  ;;  %4409 = vst [vmem:[#allocation60_spill] sm:$0xff] %v3211_v33  ;;  %v3223_v11 = vrot.slane %v2187_v17, %v3051_v24  ;;  %v3233_v54 = vrot.slane %v2169_v22, %v3051_v24  ;;  %v1808_v29 = vadd.f32 1.0, %v2457_v2  ;;  %2331 = vmatpush3.bf16.msra.mxu0 %v2443_v37  ;;  %2355 = vmatpush3.bf16.msra.mxu1 %v2443_v37 }
 0x134   : > { %2474 = vrcp.f32 %v1802_v5  ;;  %v3236_v5 = vrot.slane %v2187_v17, %v3065_v31  ;;  %v3238_v25 = vpop.permute.xlu1 %1461  ;;  %v3241_v3 = vrot.slane %v2169_v22, %v3065_v31  ;;  %v3244_v27 = vrot.slane %v2178_v58, %v3051_v24 }
 0x135   : > { %2476 = vrcp.f32 %v1803_v59  ;;  %4413 = vst [vmem:[#allocation64_spill] sm:$0xff] %v3238_v25  ;;  %v1809_v60 = vadd.f32 1.0, %v2459_v7  ;;  %v3247_v28 = vrot.slane %v2178_v58, %v3065_v31  ;;  %v3250_v56 = vrot.slane %v2196_v14, %v3051_v24  ;;  %v3252_v59 = vpop.permute.xlu0 %1456 }
 0x136   : > { %4412 = vst [vmem:[#allocation63_spill] sm:$0xff] %v3236_v5  ;;  %2478 = vrcp.f32 %v1804_v16  ;;  %4414 = vst [vmem:[#allocation65_spill] sm:$0xff] %v3241_v3  ;;  %v687_v2 = vmul.f32 1.442695, %v672_v46  ;;  %v3256_v22 = vrot.slane %v2196_v14, %v3065_v31  ;;  %v622_v24 = vadd.f32 %v3119_v34, %v358_v32 }
 0x137   : > { %2480 = vrcp.f32 %v1805_v20  ;;  %4415 = vst [vmem:[#allocation66_spill] sm:$0xff] %v3247_v28  ;;  %4416 = vst [vmem:[#allocation67_spill] sm:$0xff] %v3252_v59  ;;  %v3259_v20 = vadd.f32 %v3107_v10, %v358_v32  ;;  %v3263_v16 = vadd.f32 %v3125_v30, %v358_v32  ;;  %v625_v7 = vadd.f32 %v3147_v23, %v358_v32 }
 0x138   : > { %2482 = vrcp.f32 %v1806_v26  ;;  %4417 = vst [vmem:[#allocation68_spill] sm:$0xff] %v3256_v22  ;;  %v640_v26 = vpop.f32.mrf.mxu1  ;;  %v3275_v37 = vadd.f32 %v3167_v9, %v358_v32  ;;  %v3283_v30 = vadd.f32 %v637_v55, %v358_v32  ;;  %v3285_v23 = vadd.f32 %v2315_v36, %v358_v32 }
 0x139   : > { %4418 = vst [vmem:[#allocation69_spill] sm:$0xff] %v3259_v20  ;;  %2484 = vrcp.f32 %v1807_v61  ;;  %4419 = vst [vmem:[#allocation70_spill] sm:$0xff] %v3263_v16  ;;  %v4475_v20 = vld [vmem:[#allocation27_spill] sm:$0xff] }
 0x13a   : > { %v2461_v17 = vpop.eup %2460  ;;  %2486 = vrcp.f32 %v1808_v29  ;;  %4421 = vst [vmem:[#allocation72_spill] sm:$0xff] %v3275_v37  ;;  %4423 = vst [vmem:[#allocation74_spill] sm:$0xff] %v3283_v30  ;;  %v3289_v29 = vpop.permute.xlu1 %1481 }
 0x13b   : > { %v2463_v58 = vpop.eup %2462  ;;  %v3269_v31 = vmul.f32 %v2461_v17, %v2974_v38  ;;  %2488 = vrcp.f32 %v1809_v60  ;;  %4424 = vst [vmem:[#allocation75_spill] sm:$0xff] %v3285_v23  ;;  %4426 = vst [vmem:[#allocation77_spill] sm:$0xff] %v3289_v29  ;;  %v3296_v60 = vadd.f32 %v640_v26, %v358_v32  ;;  %v3301_v36 = vmul.f32 %v2461_v17, %v622_v24 }
 0x13c   : > { %v3266_v46 = vpop.eup %2464  ;;  %v3272_v10 = vmul.f32 %v2463_v58, %v2978_v40  ;;  %2490 = vpow2.f32 %v687_v2  ;;  %v3303_v3 = vmul.f32 %v2463_v58, %v625_v7  ;;  %v3307_v2 = vpop.permute.xlu0 %1476 }
 0x13d   : > { %4420 = vst [vmem:[#allocation71_spill] sm:$0xff] %v3266_v46  ;;  %v3277_v14 = vpop.eup %2466  ;;  %v3281_v34 = vmul.f32 %v3266_v46, %v2966_v35  ;;  %4427 = vst [vmem:[#allocation78_spill] sm:$0xff] %v3296_v60 }
 0x13e   : > { %4422 = vst [vmem:[#allocation73_spill] sm:$0xff] %v3277_v14  ;;  %v3287_v61 = vpop.eup %2468  ;;  %v3293_v9 = vmul.f32 %v3277_v14, %v2976_v39  ;;  %4428 = vst [vmem:[#allocation79_spill] sm:$0xff] %v3301_v36  ;;  %v4434_v58 = vrot.slane %v3272_v10, 7 }
 0x13f   : > { %4425 = vst [vmem:[#allocation76_spill] sm:$0xff] %v3287_v61  ;;  %v766_v28 = vrot.slane %v3281_v34, 7  ;;  %v908_v55 = vmul.f32 %v3179_v18, %v3281_v34  ;;  %4429 = vst [vmem:[#allocation80_spill] sm:$0xff] %v3303_v3  ;;  %v3305_v23 = vpop.eup %2470  ;;  %v3311_v30 = vmul.f32 %v3287_v61, %v2980_v41 }
 0x140   : > { %4430 = vst [vmem:[#allocation81_spill] sm:$0xff] %v3305_v23  ;;  %4431 = vst [vmem:[#allocation82_spill] sm:$0xff] %v3307_v2  ;;  %v768_v32 = vrot.slane %v3293_v9, 7  ;;  %v910_v26 = vmul.f32 %v3179_v18, %v3293_v9  ;;  %v3317_v60 = vpop.eup %2472  ;;  %v3321_v17 = vmul.f32 %v3305_v23, %v2982_v42  ;;  %v1005_v41 = vrot.slane %v3293_v9, 1 }
 0x141   : > { %4432 = vst [vmem:[#allocation83_spill] sm:$0xff] %v3311_v30  ;;  %4433 = vst [vmem:[#allocation84_spill] sm:$0xff] %v3317_v60  ;;  %v3327_v24 = vsel %vm779_vm0, %v4434_v58, %v766_v28  ;;  %v3333_v5 = vmul.f32 %v3317_v60, %v2984_v43  ;;  %v973_v23 = vmul.f32 %v3012_v57, %v908_v55  ;;  %v3342_v33 = vpop.eup %2474  ;;  %v4448_v16 = vrot.slane %v3311_v30, 7 }
 0x142   : > { %v3337_v22 = vsel %vm779_vm0, %v766_v28, %v768_v32  ;;  %v815_v42 = vmul.f32 %v3187_v49, %v3327_v24  ;;  %4435 = vst [vmem:[#allocation85_spill] sm:$0xff] %v3342_v33  ;;  %v770_v58 = vrot.slane %v3321_v17, 7  ;;  %v912_v43 = vmul.f32 %v3179_v18, %v3321_v17  ;;  %v3350_v61 = vpop.eup %2476  ;;  %v3352_v28 = vpop.permute.xlu1 %1561 }
 0x143   : > { %v817_v7 = vmul.f32 %v3187_v49, %v3337_v22  ;;  %v1007_v60 = vrot.slane %v3321_v17, 1  ;;  %4436 = vst [vmem:[#allocation86_spill] sm:$0xff] %v3350_v61  ;;  %4437 = vst [vmem:[#allocation87_spill] sm:$0xff] %v3352_v28  ;;  %v772_v37 = vrot.slane %v3333_v5, 7  ;;  %v975_v33 = vmul.f32 %v3002_v52, %v910_v26  ;;  %v3358_v39 = vpop.eup %2478 }
 0x144   : > { %v879_v55 = vmul.f32 %v3004_v53, %v815_v42  ;;  %v1009_v57 = vrot.slane %v3333_v5, 1  ;;  %4438 = vst [vmem:[#allocation88_spill] sm:$0xff] %v3358_v39  ;;  %v787_v40 = vsel %vm779_vm0, %v768_v32, %v770_v58  ;;  %v3368_v35 = vpop.eup %2480  ;;  %v3370_v42 = vpop.permute.xlu0 %1556  ;;  %v4476_v28 = vrot.slane %v3311_v30, 1 }
 0x145   : > { %v881_v3 = vmul.f32 %v2994_v48, %v817_v7  ;;  %v3366_v61 = vsel %vm1014_vm1, %v1005_v41, %v1007_v60  ;;  %4439 = vst [vmem:[#allocation89_spill] sm:$0xff] %v3368_v35  ;;  %v3375_v39 = vsel %vm779_vm0, %v770_v58, %v772_v37  ;;  %v819_v32 = vmul.f32 %v3187_v49, %v787_v40  ;;  %v3379_v48 = vpop.eup %2482 }
 0x146   : > { %v977_v7 = vmul.f32 %v3000_v51, %v912_v43  ;;  %4440 = vst [vmem:[#allocation90_spill] sm:$0xff] %v3379_v48  ;;  %v989_v2 = vadd.f32 %v973_v23, %v879_v55  ;;  %v3383_v52 = vsel %vm1014_vm1, %v1007_v60, %v1009_v57  ;;  %v4441_v35 = vrot.slane %v3281_v34, 1  ;;  %v3391_v58 = vpop.eup %2484  ;;  %v3415_v48 = vpop.permute.xlu1 %1581 }
 0x147   : > { %v991_v53 = vadd.f32 %v975_v33, %v881_v3  ;;  %4442 = vst [vmem:[#allocation91_spill] sm:$0xff] %v3391_v58  ;;  %v883_v14 = vmul.f32 %v2992_v47, %v819_v32  ;;  %v1053_v33 = vmul.f32 %v3200_v50, %v3366_v61  ;;  %v1055_v3 = vmul.f32 %v3200_v50, %v3383_v52  ;;  %v3400_v23 = vpop.eup %2486 }
 0x148   : > { %v3389_v26 = vsel %vm1014_vm1, %v4441_v35, %v1005_v41  ;;  %4443 = vst [vmem:[#allocation92_spill] sm:$0xff] %v3400_v23  ;;  %v4444_v60 = vrot.slane %v3311_v30, 1  ;;  %v1161_v41 = vmul.f32 %v3208_v45, %v3337_v22  ;;  %v1163_v55 = vmul.f32 %v3208_v45, %v787_v40  ;;  %v3413_v58 = vpop.eup %2488  ;;  %4446 = vst [vmem:[#allocation94_spill] sm:$0xff] %v3415_v48 }
 0x149   : > { %v1051_v43 = vmul.f32 %v3200_v50, %v3389_v26  ;;  %v1165_v32 = vmul.f32 %v3208_v45, %v3375_v39  ;;  %4445 = vst [vmem:[#allocation93_spill] sm:$0xff] %v3413_v58  ;;  %v993_v47 = vadd.f32 %v977_v7, %v883_v14  ;;  %v1118_v51 = vmul.f32 %v3026_v0, %v1053_v33  ;;  %v3431_v7 = vpop.permute.xlu0 %1576 }
 0x14a   : > { %v3406_v35 = vsel %vm1014_vm1, %v1009_v57, %v4444_v60  ;;  %v1120_v57 = vmul.f32 %v3024_v63, %v1055_v3  ;;  %v3420_v60 = vpop.eup %2490  ;;  %v3426_v38 = vsel %vm779_vm0, %v772_v37, %v4448_v16  ;;  %v1226_v36 = vmul.f32 %v3044_v19, %v1161_v41  ;;  %4450 = vst [vmem:[#allocation97_spill] sm:$0xff] %v3431_v7 }
 0x14b   : > { %v1116_v23 = vmul.f32 %v3028_v1, %v1051_v43  ;;  %4447 = vst [vmem:[#allocation95_spill] sm:$0xff] %v3420_v60  ;;  %4449 = vst [vmem:[#allocation96_spill] sm:$0xff] %v3426_v38  ;;  %v1228_v58 = vmul.f32 %v3042_v15, %v1163_v55  ;;  %v1230_v14 = vmul.f32 %v3040_v13, %v1165_v32  ;;  %v3450_v13 = vpop.permute.xlu1 %1571 }
 0x14c   : > { %v1134_v33 = vadd.f32 %v1118_v51, %v991_v53  ;;  %v1136_v0 = vadd.f32 %v1120_v57, %v993_v47  ;;  %v1271_v3 = vmul.f32 %v3190_v8, %v3293_v9  ;;  %v1273_v63 = vmul.f32 %v3190_v8, %v3321_v17  ;;  %4451 = vst [vmem:[#allocation98_spill] sm:$0xff] %v3450_v13 }
 0x14d   : > { %v1132_v43 = vadd.f32 %v1116_v23, %v989_v2  ;;  %v1316_v16 = vmul.f32 %v3233_v54, %v3366_v61  ;;  %v1318_v37 = vmul.f32 %v3233_v54, %v3383_v52  ;;  %v1320_v41 = vmul.f32 %v3233_v54, %v3406_v35 }
 0x14e   : > { %v1244_v32 = vadd.f32 %v1228_v58, %v1134_v33  ;;  %v1246_v2 = vadd.f32 %v1230_v14, %v1136_v0  ;;  %v1275_v47 = vmul.f32 %v3190_v8, %v3333_v5  ;;  %v1426_v23 = vmul.f32 %v3244_v27, %v787_v40 }
 0x14f   : > { %v1242_v55 = vadd.f32 %v1226_v36, %v1132_v43  ;;  %v1381_v51 = vmul.f32 %v3109_v6, %v1316_v16  ;;  %v1383_v53 = vmul.f32 %v3102_v62, %v1318_v37  ;;  %v1428_v57 = vmul.f32 %v3244_v27, %v3375_v39  ;;  %v3463_v43 = vpop.permute.xlu0 %1566  ;;  %v3493_v6 = vpop.permute.xlu1 %1591 }
 0x150   : > { %v1289_v19 = vadd.f32 %v1273_v63, %v1244_v32  ;;  %v1291_v1 = vadd.f32 %v1275_v47, %v1246_v2  ;;  %v1430_v0 = vmul.f32 %v3244_v27, %v3426_v38  ;;  %v1385_v36 = vmul.f32 %v3097_v4, %v1320_v41  ;;  %4452 = vst [vmem:[#allocation99_spill] sm:$0xff] %v3463_v43  ;;  %v4454_v47 = vld [vmem:[#allocation57_spill] sm:$0xff] }
 0x151   : > { %v1287_v15 = vadd.f32 %v1271_v3, %v1242_v55  ;;  %v1536_v58 = vmul.f32 %v3223_v11, %v3321_v17  ;;  %v1749_v14 = vadd.f32 %v3272_v10, %v3269_v31  ;;  %v3461_v40 = vmul.f32 %v3179_v18, %v3269_v31  ;;  %4457 = vst [vmem:[#allocation101_spill] sm:$0xff] %v3493_v6 }
 0x152   : > { %v1399_v63 = vadd.f32 %v1383_v53, %v1289_v19  ;;  %v1538_v3 = vmul.f32 %v3223_v11, %v3333_v5  ;;  %v1401_v37 = vadd.f32 %v1385_v36, %v1291_v1  ;;  %v1491_v41 = vmul.f32 %v3238_v25, %v1426_v23 }
 0x153   : > { %v1397_v33 = vadd.f32 %v1381_v51, %v1287_v15  ;;  %v1540_v55 = vmul.f32 %v3223_v11, %v3311_v30  ;;  %v906_v32 = vmul.f32 %v3179_v18, %v3272_v10  ;;  %v3475_v2 = vmul.f32 %v3420_v60, %v2986_v44  ;;  %v4470_v44 = vld [vmem:[#allocation18_spill] sm:$0xff] }
 0x154   : > { %v3479_v15 = vmul.f32 %v3200_v50, %v3406_v35  ;;  %v1493_v19 = vmul.f32 %v3202_v12, %v1428_v57  ;;  %v1495_v1 = vmul.f32 %v4454_v47, %v1430_v0  ;;  %v1601_v53 = vmul.f32 %v3450_v13, %v1536_v58  ;;  %v4461_v13 = vld [vmem:[#allocation26_spill] sm:$0xff] }
 0x155   : > { %v1507_v51 = vadd.f32 %v1491_v41, %v1397_v33  ;;  %v1750_v23 = vadd.f32 %v1749_v14, %v3281_v34  ;;  %v4455_v36 = vrot.slane %v3272_v10, 7  ;;  %v4456_v16 = vrot.slane %v3269_v31, 7  ;;  %v3512_v41 = vpop.permute.xlu0 %1586 }
 0x156   : > { %4453 = vst [vmem:[#allocation100_spill] sm:$0xff] %v3479_v15  ;;  %v1509_v4 = vadd.f32 %v1493_v19, %v1399_v63  ;;  %v1603_v57 = vmul.f32 %v3431_v7, %v1538_v3  ;;  %v3498_v0 = vmul.f32 %v3250_v56, %v3389_v26  ;;  %v3502_v14 = vadd.f32 %v1495_v1, %v1401_v37  ;;  %v4460_v19 = vld [vmem:[#allocation22_spill] sm:$0xff] }
 0x157   : > { %v3491_v25 = vsel %vm779_vm0, %v4456_v16, %v4455_v36  ;;  %v3505_v33 = vmul.f32 %v3415_v48, %v1540_v55  ;;  %v3509_v16 = vmul.f32 %v3250_v56, %v3383_v52  ;;  %v1751_v63 = vadd.f32 %v1750_v23, %v3293_v9  ;;  %4459 = vst [vmem:[#allocation103_spill] sm:$0xff] %v3512_v41 }
 0x158   : > { %4458 = vst [vmem:[#allocation102_spill] sm:$0xff] %v3498_v0  ;;  %v813_v58 = vmul.f32 %v3187_v49, %v3491_v25  ;;  %v3516_v3 = vmul.f32 %v3250_v56, %v3406_v35  ;;  %v1001_v37 = vrot.slane %v3272_v10, 1  ;;  %v1159_v55 = vmul.f32 %v3208_v45, %v3327_v24 }
 0x159   : > { %v3522_v1 = vadd.f32 %v1601_v53, %v1507_v51  ;;  %v1752_v52 = vadd.f32 %v1751_v63, %v3321_v17  ;;  %v971_v48 = vmul.f32 %v4461_v13, %v906_v32  ;;  %v1314_v23 = vmul.f32 %v3233_v54, %v3389_v26  ;;  %v4465_v63 = vld [vmem:[#allocation51_spill] sm:$0xff]  ;;  %v4471_v13 = vld [vmem:[#allocation17_spill] sm:$0xff] }
 0x15a   : > { %v877_v36 = vmul.f32 %v4460_v19, %v813_v58  ;;  %v3528_v7 = vadd.f32 %v1603_v57, %v1509_v4  ;;  %v4462_v35 = vrot.slane %v3281_v34, 1  ;;  %v1269_v47 = vmul.f32 %v3190_v8, %v3281_v34  ;;  %v4463_v4 = vld [vmem:[#allocation43_spill] sm:$0xff]  ;;  %v3544_v57 = vpop.permute.xlu1 %1671 }
 0x15b   : > { %v1424_v51 = vmul.f32 %v3244_v27, %v3337_v22  ;;  %v1753_v17 = vadd.f32 %v1752_v52, %v3333_v5  ;;  %v1224_v53 = vmul.f32 %v4463_v4, %v1159_v55  ;;  %4464 = vst [vmem:[#allocation104_spill] sm:$0xff] %v3544_v57  ;;  %v1379_v12 = vmul.f32 %v4465_v63, %v1314_v23  ;;  %v3557_v57 = vpop.permute.xlu0 %1666 }
 0x15c   : > { %v3534_v58 = vsel %vm1014_vm1, %v1001_v37, %v4462_v35  ;;  %v987_v32 = vadd.f32 %v971_v48, %v877_v36  ;;  %v1534_v35 = vmul.f32 %v3223_v11, %v3293_v9  ;;  %v776_v62 = vrot.slane %v3475_v2, 7  ;;  %v4466_v48 = vld [vmem:[#allocation34_spill] sm:$0xff] }
 0x15d   : > { %v1049_v26 = vmul.f32 %v3200_v50, %v3534_v58  ;;  %v823_v22 = vmul.f32 %v3187_v49, %v3426_v38  ;;  %v1754_v52 = vadd.f32 %v1753_v17, %v3311_v30  ;;  %v1489_v0 = vmul.f32 %v3252_v59, %v1424_v51  ;;  %v4469_v51 = vld [vmem:[#allocation23_spill] sm:$0xff]  ;;  %v4486_v38 = vld [vmem:[#allocation44_spill] sm:$0xff] }
 0x15e   : > { %v902_v55 = vmul.f32 %v3179_v18, %v3475_v2  ;;  %v1644_v23 = vmul.f32 %v3250_v56, %v3366_v61  ;;  %v4467_v9 = vrot.slane %v3311_v30, 7  ;;  %v4468_v17 = vrot.slane %v3269_v31, 7  ;;  %v3587_v46 = vpop.permute.xlu1 %1691 }
 0x15f   : > { %v1114_v36 = vmul.f32 %v4466_v48, %v1049_v26  ;;  %v887_v59 = vmul.f32 %v4469_v51, %v823_v22  ;;  %v1755_v4 = vadd.f32 %v1754_v52, %v3475_v2  ;;  %v4472_v52 = vld [vmem:[#allocation14_spill] sm:$0xff]  ;;  %4474 = vst [vmem:[#allocation105_spill] sm:$0xff] %v3587_v46 }
 0x160   : > { %v3565_v63 = vsel %vm779_vm0, %v4467_v9, %v776_v62  ;;  %v3571_v26 = vsel %vm779_vm0, %v776_v62, %v4468_v17  ;;  %v916_v9 = vmul.f32 %v3179_v18, %v3311_v30  ;;  %v967_v60 = vmul.f32 %v4470_v44, %v902_v55 }
 0x161   : > { %v1130_v48 = vadd.f32 %v1114_v36, %v987_v32  ;;  %v809_v61 = vmul.f32 %v3187_v49, %v3565_v63  ;;  %v811_v19 = vmul.f32 %v3187_v49, %v3571_v26  ;;  %v969_v62 = vmul.f32 %v4471_v13, %v3461_v40  ;;  %v4473_v36 = vld [vmem:[#allocation13_spill] sm:$0xff] }
 0x162   : > { %v1013_v17 = vrot.slane %v3475_v2, 1  ;;  %v1756_v22 = vrot.slane %v1755_v4, 4  ;;  %v981_v15 = vmul.f32 %v4475_v20, %v916_v9  ;;  %v4478_v40 = vrot.slane %v3269_v31, 1 }
 0x163   : > { %v1240_v51 = vadd.f32 %v1224_v53, %v1130_v48  ;;  %v873_v32 = vmul.f32 %v4472_v52, %v809_v61  ;;  %v875_v41 = vmul.f32 %v4473_v36, %v811_v19  ;;  %v3608_v36 = vpop.permute.xlu0 %1686 }
 0x164   : > { %v3594_v55 = vsel %vm1014_vm1, %v4476_v28, %v1013_v17  ;;  %v3600_v44 = vsel %vm1014_vm1, %v4478_v40, %v1001_v37  ;;  %v4479_v53 = vmov %v4478_v40  ;;  %v1757_v48 = vadd.f32 %v1756_v22, %v1755_v4  ;;  %4480 = vst [vmem:[#allocation107_spill] sm:$0xff] %v3608_v36 }
 0x165   : > { %4477 = vst [vmem:[#allocation106_spill] sm:$0xff] %v3594_v55  ;;  %v3606_v19 = vsel %vm1014_vm1, %v1013_v17, %v4479_v53  ;;  %v1285_v61 = vadd.f32 %v1269_v47, %v1240_v51  ;;  %v983_v9 = vadd.f32 %v967_v60, %v873_v32  ;;  %v985_v46 = vadd.f32 %v969_v62, %v875_v41  ;;  %v4481_v47 = vld [vmem:[#allocation30_spill] sm:$0xff]  ;;  %v4483_v51 = vld [vmem:[#allocation35_spill] sm:$0xff] }
 0x166   : > { %v997_v28 = vadd.f32 %v981_v15, %v887_v59  ;;  %v1045_v52 = vmul.f32 %v3200_v50, %v3606_v19  ;;  %v1047_v37 = vmul.f32 %v3200_v50, %v3600_v44  ;;  %v1059_v40 = vmul.f32 %v3200_v50, %v3594_v55  ;;  %v4482_v59 = vld [vmem:[#allocation29_spill] sm:$0xff] }
 0x167   : > { %v1758_v20 = vrot.slane %v1757_v48, 2  ;;  %v1395_v21 = vadd.f32 %v1379_v12, %v1285_v61  ;;  %v1155_v4 = vmul.f32 %v3208_v45, %v3571_v26  ;;  %v1157_v60 = vmul.f32 %v3208_v45, %v3491_v25  ;;  %v4484_v12 = vld [vmem:[#allocation38_spill] sm:$0xff]  ;;  %v3627_v61 = vpop.permute.xlu1 %1681 }
 0x168   : > { %v1110_v41 = vmul.f32 %v4481_v47, %v1045_v52  ;;  %v1112_v15 = vmul.f32 %v4482_v59, %v1047_v37  ;;  %v1124_v62 = vmul.f32 %v4483_v51, %v1059_v40  ;;  %v1169_v17 = vmul.f32 %v3208_v45, %v3565_v63  ;;  %4485 = vst [vmem:[#allocation38_spill] sm:$0xff] %v3627_v61  ;;  %v4487_v59 = vld [vmem:[#allocation37_spill] sm:$0xff] }
 0x169   : > { %v1759_v22 = vadd.f32 %v1758_v20, %v1757_v48  ;;  %v1505_v32 = vadd.f32 %v1489_v0, %v1395_v21  ;;  %v1599_v50 = vmul.f32 %v3463_v43, %v1534_v35  ;;  %v1220_v53 = vmul.f32 %v4484_v12, %v1155_v4  ;;  %v3633_v20 = vpop.permute.xlu0 %1676  ;;  %v4551_v43 = vld [vmem:[#allocation27_spill] sm:$0xff] }
 0x16a   : > { %v1126_v13 = vadd.f32 %v1110_v41, %v983_v9  ;;  %v1128_v30 = vadd.f32 %v1112_v15, %v985_v46  ;;  %v1140_v55 = vadd.f32 %v1124_v62, %v997_v28  ;;  %v1234_v52 = vmul.f32 %v4486_v38, %v1169_v17  ;;  %4488 = vst [vmem:[#allocation37_spill] sm:$0xff] %v3633_v20  ;;  %v4491_v62 = vld [vmem:[#allocation52_spill] sm:$0xff] }
 0x16b   : > { %v1711_v37 = vmul.f32 %v3627_v61, %v3509_v16  ;;  %v1760_v40 = vrot.slane %v1759_v22, 1  ;;  %v1615_v51 = vadd.f32 %v1599_v50, %v1505_v32  ;;  %v1222_v47 = vmul.f32 %v4487_v59, %v1157_v60  ;;  %v4546_v61 = vld [vmem:[#allocation84_spill] sm:$0xff] }
 0x16c   : > { %v1236_v21 = vadd.f32 %v1220_v53, %v1126_v13  ;;  %v1250_v0 = vadd.f32 %v1234_v52, %v1140_v55  ;;  %v1265_v35 = vmul.f32 %v3190_v8, %v3269_v31  ;;  %v1279_v46 = vmul.f32 %v3190_v8, %v3475_v2 }
 0x16d   : > { %v3641_v48 = vadd.f32 %v3505_v33, %v3502_v14  ;;  %v1709_v16 = vmul.f32 %v3633_v20, %v1644_v23  ;;  %v1238_v9 = vadd.f32 %v1222_v47, %v1128_v30  ;;  %v1310_v28 = vmul.f32 %v3233_v54, %v3600_v44  ;;  %v4490_v30 = vld [vmem:[#allocation47_spill] sm:$0xff] }
 0x16e   : > { %v3646_v4 = vadd.f32 %v1760_v40, %v1759_v22  ;;  %v1281_v13 = vadd.f32 %v1265_v35, %v1236_v21  ;;  %v1295_v55 = vadd.f32 %v1279_v46, %v1250_v0  ;;  %v1324_v60 = vmul.f32 %v3233_v54, %v3606_v19  ;;  %v4493_v0 = vld [vmem:[#allocation46_spill] sm:$0xff] }
 0x16f   : > { %4489 = vst [vmem:[#allocation108_spill] sm:$0xff] %v3641_v48  ;;  %v1713_v41 = vmul.f32 %v3608_v36, %v3516_v3  ;;  %v1267_v14 = vmul.f32 %v3190_v8, %v3272_v10  ;;  %v1312_v33 = vmul.f32 %v3233_v54, %v3534_v58  ;;  %v1375_v23 = vmul.f32 %v4490_v30, %v1310_v28 }
 0x170   : > { %v1727_v47 = vadd.f32 %v1711_v37, %v3522_v1  ;;  %v1725_v15 = vadd.f32 %v1709_v16, %v1615_v51  ;;  %v1389_v17 = vmul.f32 %v4491_v62, %v1324_v60  ;;  %v1420_v22 = vmul.f32 %v3244_v27, %v3491_v25  ;;  %v4492_v1 = vld [vmem:[#allocation55_spill] sm:$0xff] }
 0x171   : > { %v1283_v32 = vadd.f32 %v1267_v14, %v1238_v9  ;;  %v1391_v50 = vadd.f32 %v1375_v23, %v1281_v13  ;;  %v1434_v3 = vmul.f32 %v3244_v27, %v3571_v26  ;;  %v1530_v53 = vmul.f32 %v3223_v11, %v3272_v10  ;;  %v3691_v23 = vpop.permute.xlu1 %1701 }
 0x172   : > { %v1729_v52 = vadd.f32 %v1713_v41, %v3528_v7  ;;  %v1769_v40 = vadd.f32 %v3646_v4, %v1727_v47  ;;  %v1405_v21 = vadd.f32 %v1389_v17, %v1295_v55  ;;  %v1485_v51 = vmul.f32 %v4492_v1, %v1420_v22  ;;  %4495 = vst [vmem:[#allocation55_spill] sm:$0xff] %v3691_v23  ;;  %v4496_v47 = vld [vmem:[#allocation54_spill] sm:$0xff]  ;;  %v4498_v22 = vld [vmem:[#allocation96_spill] sm:$0xff] }
 0x173   : > { %v1767_v37 = vadd.f32 %v3646_v4, %v1725_v15  ;;  %v1377_v35 = vmul.f32 %v4493_v0, %v1312_v33  ;;  %v1499_v25 = vmul.f32 %v3289_v29, %v1434_v3  ;;  %v1544_v46 = vmul.f32 %v3223_v11, %v3269_v31  ;;  %v4501_v3 = vld [vmem:[#allocation28_spill] sm:$0xff] }
 0x174   : > { %v1422_v26 = vmul.f32 %v3244_v27, %v3327_v24  ;;  %v1501_v10 = vadd.f32 %v1485_v51, %v1391_v50  ;;  %v1595_v7 = vmul.f32 %v3370_v42, %v1530_v53  ;;  %v1640_v16 = vmul.f32 %v3250_v56, %v3534_v58  ;;  %v4544_v29 = vld [vmem:[#allocation20_spill] sm:$0xff] }
 0x175   : > { %v3679_v9 = vadd.f32 %v3646_v4, %v1729_v52  ;;  %v1393_v28 = vadd.f32 %v1377_v35, %v1283_v32  ;;  %v1515_v13 = vadd.f32 %v1499_v25, %v1405_v21  ;;  %v1609_v55 = vmul.f32 %v3493_v6, %v1544_v46  ;;  %v4499_v32 = vld [vmem:[#allocation106_spill] sm:$0xff]  ;;  %v4504_v21 = vld [vmem:[#allocation36_spill] sm:$0xff] }
 0x176   : > { %v1532_v60 = vmul.f32 %v3223_v11, %v3281_v34  ;;  %v1611_v31 = vadd.f32 %v1595_v7, %v1501_v10  ;;  %v1654_v24 = vmul.f32 %v3250_v56, %v3600_v44  ;;  %v821_v41 = vmul.f32 %v3187_v49, %v3375_v39  ;;  %v4497_v34 = vld [vmem:[#allocation24_spill] sm:$0xff]  ;;  %v4540_v6 = vld [vmem:[#allocation10_spill] sm:$0xff] }
 0x177   : > { %4494 = vst [vmem:[#allocation47_spill] sm:$0xff] %v3679_v9  ;;  %2492 = vrcp.f32 %v1769_v40  ;;  %v1625_v14 = vadd.f32 %v1609_v55, %v1515_v13  ;;  %v1705_v58 = vmul.f32 %v3557_v57, %v1640_v16  ;;  %v914_v33 = vmul.f32 %v3179_v18, %v3333_v5  ;;  %v4502_v5 = vld [vmem:[#allocation87_spill] sm:$0xff]  ;;  %v4503_v40 = vld [vmem:[#allocation100_spill] sm:$0xff] }
 0x178   : > { %2494 = vrcp.f32 %v1767_v37  ;;  %v1487_v15 = vmul.f32 %v4496_v47, %v1422_v26  ;;  %v885_v17 = vmul.f32 %v4497_v34, %v821_v41  ;;  %v1167_v44 = vmul.f32 %v3208_v45, %v4498_v22  ;;  %v4505_v26 = vld [vmem:[#allocation45_spill] sm:$0xff]  ;;  %v4507_v13 = vld [vmem:[#allocation71_spill] sm:$0xff] }
 0x179   : > { %v3699_v39 = vmul.f32 %v3250_v56, %v4499_v32  ;;  %v1719_v49 = vmul.f32 %v3691_v23, %v1654_v24  ;;  %v1721_v50 = vadd.f32 %v1705_v58, %v1611_v31  ;;  %v979_v53 = vmul.f32 %v4501_v3, %v914_v33  ;;  %v4508_v31 = vld [vmem:[#allocation79_spill] sm:$0xff]  ;;  %v4509_v24 = vld [vmem:[#allocation6_spill] sm:$0xff] }
 0x17a   : > { %v1503_v18 = vadd.f32 %v1487_v15, %v1393_v28  ;;  %v1597_v52 = vmul.f32 %v4502_v5, %v1532_v60  ;;  %v1122_v51 = vmul.f32 %v4504_v21, %v4503_v40  ;;  %v1322_v37 = vmul.f32 %v3233_v54, %v4499_v32  ;;  %v4506_v28 = vld [vmem:[#allocation69_spill] sm:$0xff]  ;;  %v4512_v33 = vld [vmem:[#allocation83_spill] sm:$0xff]  ;;  %v4519_v40 = vld [vmem:[#allocation80_spill] sm:$0xff] }
 0x17b   : > { %4500 = vst [vmem:[#allocation46_spill] sm:$0xff] %v3699_v39  ;;  %v1735_v35 = vadd.f32 %v1719_v49, %v1625_v14  ;;  %v1763_v45 = vadd.f32 %v3646_v4, %v1721_v50  ;;  %v995_v25 = vadd.f32 %v979_v53, %v885_v17  ;;  %v1432_v46 = vmul.f32 %v3244_v27, %v3565_v63  ;;  %v4510_v14 = vld [vmem:[#allocation70_spill] sm:$0xff]  ;;  %v4511_v27 = vld [vmem:[#allocation73_spill] sm:$0xff]  ;;  %v3733_v17 = vpop.permute.xlu0 %1696  ;;  %v4517_v49 = vld [vmem:[#allocation56_spill] sm:$0xff] }
 0x17c   : > { %v1232_v10 = vmul.f32 %v4505_v26, %v1167_v44  ;;  %v1542_v7 = vmul.f32 %v3223_v11, %v3475_v2  ;;  %v1652_v16 = vmul.f32 %v3250_v56, %v3606_v19  ;;  %v691_v55 = vmul.f32 %v4507_v13, %v4506_v28  ;;  %v4513_v2 = vld [vmem:[#allocation53_spill] sm:$0xff]  ;;  %4515 = vst [vmem:[#allocation54_spill] sm:$0xff] %v3733_v17  ;;  %v4516_v44 = vld [vmem:[#allocation82_spill] sm:$0xff]  ;;  %v4518_v53 = vld [vmem:[#allocation103_spill] sm:$0xff] }
 0x17d   : > { %v1777_v54 = vadd.f32 %v3646_v4, %v1735_v35  ;;  %v1138_v60 = vadd.f32 %v1122_v51, %v995_v25  ;;  %v3721_v41 = vmul.f32 %v4509_v24, %v4508_v31  ;;  %v692_v63 = vmul.f32 %v4511_v27, %v4510_v14  ;;  %v4514_v19 = vld [vmem:[#allocation5_spill] sm:$0xff]  ;;  %v4520_v51 = vld [vmem:[#allocation8_spill] sm:$0xff]  ;;  %v4572_v39 = vld [vmem:[#allocation14_spill] sm:$0xff] }
 0x17e   : > { %v3725_v58 = vadd.f32 %v1597_v52, %v1503_v18  ;;  %v1277_v11 = vmul.f32 %v3190_v8, %v4512_v33  ;;  %v1387_v56 = vmul.f32 %v4513_v2, %v1322_v37  ;;  %v3731_v15 = vmul.f32 %v4514_v19, %v691_v55  ;;  %v4524_v31 = vld [vmem:[#allocation60_spill] sm:$0xff]  ;;  %v4528_v33 = vld [vmem:[#allocation25_spill] sm:$0xff]  ;;  %v4529_v19 = vld [vmem:[#allocation63_spill] sm:$0xff] }
 0x17f   : > { %2496 = vrcp.f32 %v1763_v45  ;;  %v1248_v22 = vadd.f32 %v1232_v10, %v1138_v60  ;;  %v1497_v32 = vmul.f32 %v4516_v44, %v1432_v46  ;;  %v903_v50 = vmul.f32 %v4517_v49, %v3721_v41  ;;  %v4521_v45 = vld [vmem:[#allocation7_spill] sm:$0xff]  ;;  %v4522_v46 = vld [vmem:[#allocation72_spill] sm:$0xff]  ;;  %v4535_v55 = vld [vmem:[#allocation74_spill] sm:$0xff] }
 0x180   : > { %v1607_v18 = vmul.f32 %v4518_v53, %v1542_v7  ;;  %v1717_v52 = vmul.f32 %v3733_v17, %v1652_v16  ;;  %v907_v8 = vmul.f32 %v4517_v49, %v3731_v15  ;;  %v3744_v37 = vmul.f32 %v4520_v51, %v4519_v40  ;;  %v4523_v10 = vld [vmem:[#allocation76_spill] sm:$0xff] }
 0x181   : > { %2498 = vrcp.f32 %v1777_v54  ;;  %v1293_v35 = vadd.f32 %v1277_v11, %v1248_v22  ;;  %v3747_v25 = vmul.f32 %v4521_v45, %v692_v63  ;;  %v695_v28 = vmul.f32 %v4523_v10, %v4522_v46  ;;  %v4526_v54 = vld [vmem:[#allocation17_spill] sm:$0xff] }
 0x182   : > { %v765_v13 = vrot.slane %v3731_v15, 7  ;;  %v761_v16 = vrot.slane %v3721_v41, 7  ;;  %v3757_v24 = vmul.f32 %v4524_v31, %v3731_v15  ;;  %v3760_v14 = vmul.f32 %v4526_v54, %v903_v50 }
 0x183   : > { %v1403_v60 = vadd.f32 %v1387_v56, %v1293_v35  ;;  %v767_v27 = vrot.slane %v3747_v25, 7  ;;  %v3766_v11 = vmul.f32 %v4528_v33, %v907_v8  ;;  %v3770_v22 = vmul.f32 %v4529_v19, %v3721_v41  ;;  %v4532_v8 = vld [vmem:[#allocation9_spill] sm:$0xff] }
 0x184   : > { %4525 = vst [vmem:[#allocation24_spill] sm:$0xff] %v3757_v24  ;;  %v3763_v63 = vpop.eup %2492  ;;  %v905_v56 = vmul.f32 %v4517_v49, %v3744_v37  ;;  %v1736_v40 = vadd.f32 %v3744_v37, %v3721_v41  ;;  %v909_v35 = vmul.f32 %v4517_v49, %v3747_v25  ;;  %v763_v45 = vrot.slane %v3744_v37, 7  ;;  %v4580_v24 = vld [vmem:[#allocation21_spill] sm:$0xff] }
 0x185   : > { %4527 = vst [vmem:[#allocation96_spill] sm:$0xff] %v3763_v63  ;;  %4530 = vst [vmem:[#allocation106_spill] sm:$0xff] %v3770_v22  ;;  %v3776_v51 = vpop.eup %2494  ;;  %v1513_v50 = vadd.f32 %v1497_v32, %v1403_v60  ;;  %v3782_v46 = vmul.f32 %v4532_v8, %v695_v28  ;;  %v3786_v54 = vsel %vm779_vm0, %v765_v13, %v767_v27  ;;  %v1000_v33 = vrot.slane %v3744_v37, 1  ;;  %v4536_v63 = vld [vmem:[#allocation81_spill] sm:$0xff]  ;;  %v4539_v8 = vld [vmem:[#allocation26_spill] sm:$0xff] }
 0x186   : > { %4531 = vst [vmem:[#allocation28_spill] sm:$0xff] %v3776_v51  ;;  %4534 = vst [vmem:[#allocation87_spill] sm:$0xff] %v3786_v54  ;;  %v1737_v7 = vadd.f32 %v1736_v40, %v3731_v15  ;;  %v693_v51 = vmul.f32 %v4536_v63, %v4535_v55  ;;  %v3795_v23 = vmul.f32 %v4524_v31, %v3747_v25  ;;  %v4542_v55 = vld [vmem:[#allocation95_spill] sm:$0xff]  ;;  %v4543_v60 = vld [vmem:[#allocation58_spill] sm:$0xff]  ;;  %v4560_v36 = vrot.slane %v3747_v25, 1 }
 0x187   : > { %v1623_v32 = vadd.f32 %v1607_v18, %v1513_v50  ;;  %v3799_v28 = vmul.f32 %v4529_v19, %v3747_v25  ;;  %v3802_v17 = vmul.f32 %v4539_v8, %v905_v56  ;;  %v915_v40 = vmul.f32 %v4517_v49, %v3782_v46  ;;  %v4541_v18 = vld [vmem:[#allocation75_spill] sm:$0xff] }
 0x188   : > { %4537 = vst [vmem:[#allocation100_spill] sm:$0xff] %v3795_v23  ;;  %v3807_v22 = vmul.f32 %v4540_v6, %v693_v51  ;;  %v696_v63 = vmul.f32 %v4542_v55, %v4541_v18  ;;  %v3813_v53 = vmul.f32 %v4543_v60, %v3786_v54  ;;  %v3816_v44 = vmul.f32 %v4544_v29, %v909_v35  ;;  %v4545_v51 = vld [vmem:[#allocation78_spill] sm:$0xff]  ;;  %v4549_v35 = vld [vmem:[#allocation12_spill] sm:$0xff]  ;;  %v4558_v55 = vld [vmem:[#allocation19_spill] sm:$0xff] }
 0x189   : > { %4538 = vst [vmem:[#allocation69_spill] sm:$0xff] %v3799_v28  ;;  %v1733_v50 = vadd.f32 %v1717_v52, %v1623_v32  ;;  %v1738_v56 = vadd.f32 %v1737_v7, %v3747_v25  ;;  %v694_v18 = vmul.f32 %v4546_v61, %v4545_v51  ;;  %v4547_v52 = vld [vmem:[#allocation62_spill] sm:$0xff]  ;;  %v3838_v6 = vmul.f32 %v4551_v43, %v915_v40 }
 0x18a   : > { %v911_v62 = vmul.f32 %v4517_v49, %v3807_v22  ;;  %v3827_v32 = vmul.f32 %v4547_v52, %v3786_v54  ;;  %v3832_v7 = vmul.f32 %v4549_v35, %v696_v63  ;;  %v3842_v61 = vmul.f32 %v4524_v31, %v3782_v46 }
 0x18b   : > { %v1775_v20 = vadd.f32 %v3646_v4, %v1733_v50  ;;  %4552 = vst [vmem:[#allocation6_spill] sm:$0xff] %v3838_v6  ;;  %v3846_v51 = vsel %vm779_vm0, %v763_v45, %v765_v13  ;;  %v4554_v29 = vrot.slane %v3807_v22, 7  ;;  %v3856_v50 = vmul.f32 %v4529_v19, %v3807_v22 }
 0x18c   : > { %4548 = vst [vmem:[#allocation71_spill] sm:$0xff] %v3827_v32  ;;  %v3834_v8 = vpop.eup %2496  ;;  %4553 = vst [vmem:[#allocation70_spill] sm:$0xff] %v3842_v61  ;;  %v1739_v43 = vadd.f32 %v1738_v56, %v3807_v22  ;;  %v775_v40 = vrot.slane %v3832_v7, 7  ;;  %v3863_v28 = vmul.f32 %v4558_v55, %v911_v62  ;;  %v4559_v13 = vrot.slane %v3807_v22, 1  ;;  %v4574_v61 = vld [vmem:[#allocation13_spill] sm:$0xff] }
 0x18d   : > { %4550 = vst [vmem:[#allocation79_spill] sm:$0xff] %v3834_v8  ;;  %v3852_v63 = vsel %vm779_vm0, %v767_v27, %v4554_v29  ;;  %4556 = vst [vmem:[#allocation83_spill] sm:$0xff] %v3856_v50  ;;  %v4561_v50 = vld [vmem:[#allocation11_spill] sm:$0xff]  ;;  %v4562_v56 = vrot.slane %v3782_v46, 7  ;;  %v901_v55 = vmul.f32 %v4517_v49, %v3832_v7  ;;  %2500 = vrcp.f32 %v1775_v20 }
 0x18e   : > { %4555 = vst [vmem:[#allocation73_spill] sm:$0xff] %v3852_v63  ;;  %v3860_v35 = vpop.eup %2498  ;;  %v3871_v27 = vsel %vm1014_vm1, %v4560_v36, %v4559_v13  ;;  %v3875_v54 = vmul.f32 %v4561_v50, %v694_v18  ;;  %v3885_v62 = vsel %vm779_vm0, %v775_v40, %v761_v16  ;;  %v3891_v36 = vsel %vm779_vm0, %v761_v16, %v763_v45 }
 0x18f   : > { %4557 = vst [vmem:[#allocation5_spill] sm:$0xff] %v3860_v35  ;;  %v3881_v35 = vsel %vm779_vm0, %v4562_v56, %v775_v40  ;;  %4564 = vst [vmem:[#allocation80_spill] sm:$0xff] %v3885_v62  ;;  %v3895_v18 = vmul.f32 %v4543_v60, %v3852_v63  ;;  %v810_v13 = vmul.f32 %v4543_v60, %v3885_v62  ;;  %v4565_v40 = vld [vmem:[#allocation65_spill] sm:$0xff]  ;;  %v4567_v29 = vrot.slane %v3721_v41, 1 }
 0x190   : > { %4563 = vst [vmem:[#allocation56_spill] sm:$0xff] %v3881_v35  ;;  %v808_v50 = vmul.f32 %v4543_v60, %v3881_v35  ;;  %v3903_v56 = vmul.f32 %v4565_v40, %v3871_v27  ;;  %v4568_v16 = vrot.slane %v3832_v7, 1  ;;  %v3915_v45 = vmul.f32 %v4524_v31, %v3832_v7 }
 0x191   : > { %v3919_v9 = vmul.f32 %v4529_v19, %v3832_v7  ;;  %v1740_v48 = vadd.f32 %v1739_v43, %v3875_v54  ;;  %v814_v23 = vmul.f32 %v4543_v60, %v3846_v51  ;;  %v4575_v38 = vrot.slane %v3721_v41, 1 }
 0x192   : > { %4566 = vst [vmem:[#allocation8_spill] sm:$0xff] %v3903_v56  ;;  %v3911_v20 = vsel %vm1014_vm1, %v4568_v16, %v4567_v29  ;;  %4570 = vst [vmem:[#allocation72_spill] sm:$0xff] %v3915_v45  ;;  %v812_v56 = vmul.f32 %v4543_v60, %v3891_v36  ;;  %v872_v2 = vmul.f32 %v4572_v39, %v808_v50  ;;  %v4573_v29 = vld [vmem:[#allocation18_spill] sm:$0xff]  ;;  %v4581_v21 = vrot.slane %v3747_v25, 1 }
 0x193   : > { %4569 = vst [vmem:[#allocation7_spill] sm:$0xff] %v3911_v20  ;;  %4571 = vst [vmem:[#allocation76_spill] sm:$0xff] %v3919_v9  ;;  %v966_v16 = vmul.f32 %v4573_v29, %v901_v55  ;;  %v874_v45 = vmul.f32 %v4574_v61, %v810_v13  ;;  %v3934_v9 = vsel %vm1014_vm1, %v4575_v38, %v1000_v33  ;;  %v4577_v55 = vrot.slane %v3731_v15, 1  ;;  %v4578_v38 = vld [vmem:[#allocation61_spill] sm:$0xff] }
 0x194   : > { %v3938_v43 = vmul.f32 %v4547_v52, %v3881_v35  ;;  %v913_v26 = vmul.f32 %v4517_v49, %v3875_v54  ;;  %v1741_v39 = vadd.f32 %v1740_v48, %v3782_v46  ;;  %v1044_v29 = vmul.f32 %v4578_v38, %v3911_v20 }
 0x195   : > { %v1025_v61 = vsel %vm1014_vm1, %v1000_v33, %v4577_v55  ;;  %v982_v50 = vadd.f32 %v966_v16, %v872_v2  ;;  %v984_v13 = vadd.f32 %v3760_v14, %v874_v45  ;;  %v1046_v8 = vmul.f32 %v4578_v38, %v3934_v9  ;;  %v4583_v33 = vld [vmem:[#allocation30_spill] sm:$0xff]  ;;  %v4584_v16 = vld [vmem:[#allocation29_spill] sm:$0xff] }
 0x196   : > { %4576 = vst [vmem:[#allocation60_spill] sm:$0xff] %v3938_v43  ;;  %v1742_v35 = vadd.f32 %v1741_v39, %v3832_v7  ;;  %v4579_v43 = vld [vmem:[#allocation22_spill] sm:$0xff]  ;;  %v878_v48 = vmul.f32 %v4580_v24, %v814_v23  ;;  %v4582_v6 = vmov %v4577_v55  ;;  %v1048_v14 = vmul.f32 %v4578_v38, %v1025_v61 }
 0x197   : > { %v876_v49 = vmul.f32 %v4579_v43, %v812_v56  ;;  %v3961_v2 = vsel %vm1014_vm1, %v4582_v6, %v4581_v21  ;;  %v1109_v45 = vmul.f32 %v4583_v33, %v1044_v29  ;;  %v1111_v55 = vmul.f32 %v4584_v16, %v1046_v8 }
 0x198   : > { %v1154_v39 = vmul.f32 %v4547_v52, %v3885_v62  ;;  %v3970_v23 = vmul.f32 %v4565_v40, %v3911_v20  ;;  %v3973_v25 = vmul.f32 %v4501_v3, %v913_v26  ;;  %v1743_v24 = vrot.slane %v1742_v35, 4  ;;  %v4586_v26 = vld [vmem:[#allocation34_spill] sm:$0xff] }
 0x199   : > { %v1156_v21 = vmul.f32 %v4547_v52, %v3891_v36  ;;  %v1050_v6 = vmul.f32 %v4578_v38, %v3961_v2  ;;  %v1125_v56 = vadd.f32 %v1109_v45, %v982_v50  ;;  %v1127_v43 = vadd.f32 %v1111_v55, %v984_v13 }
 0x19a   : > { %4585 = vst [vmem:[#allocation17_spill] sm:$0xff] %v3970_v23  ;;  %v1219_v8 = vmul.f32 %v4484_v12, %v1154_v39  ;;  %v1008_v29 = vrot.slane %v3875_v54, 1  ;;  %v1744_v33 = vadd.f32 %v1743_v24, %v1742_v35  ;;  %v986_v16 = vadd.f32 %v3802_v17, %v876_v49  ;;  %v3991_v13 = vpop.eup %2500  ;;  %v4587_v17 = vld [vmem:[#allocation33_spill] sm:$0xff]  ;;  %v4588_v24 = vld [vmem:[#allocation66_spill] sm:$0xff] }
 0x19b   : > { %v1221_v20 = vmul.f32 %v4487_v59, %v1156_v21  ;;  %v988_v3 = vadd.f32 %v3766_v11, %v878_v48  ;;  %v1113_v62 = vmul.f32 %v4586_v26, %v1048_v14  ;;  %v1264_v32 = vmul.f32 %v4524_v31, %v3721_v41 }
 0x19c   : > { %v1235_v23 = vadd.f32 %v1219_v8, %v1125_v56  ;;  %v1745_v63 = vrot.slane %v1744_v33, 2  ;;  %v1266_v12 = vmul.f32 %v4524_v31, %v3744_v37  ;;  %v1309_v35 = vmul.f32 %v4565_v40, %v3934_v9 }
 0x19d   : > { %v1237_v50 = vadd.f32 %v1221_v20, %v1127_v43  ;;  %v1115_v59 = vmul.f32 %v4587_v17, %v1050_v6  ;;  %v1158_v11 = vmul.f32 %v4547_v52, %v3846_v51  ;;  %v1311_v48 = vmul.f32 %v4565_v40, %v1025_v61 }
 0x19e   : > { %v1280_v49 = vadd.f32 %v1264_v32, %v1235_v23  ;;  %v1746_v14 = vadd.f32 %v1745_v63, %v1744_v33  ;;  %v1129_v41 = vadd.f32 %v1113_v62, %v986_v16  ;;  %v1374_v20 = vmul.f32 %v4490_v30, %v1309_v35  ;;  %v4589_v62 = vld [vmem:[#allocation43_spill] sm:$0xff]  ;;  %v4590_v16 = vld [vmem:[#allocation68_spill] sm:$0xff] }
 0x19f   : > { %v1282_v45 = vadd.f32 %v1266_v12, %v1237_v50  ;;  %v3998_v55 = vadd.f32 %v1115_v59, %v988_v3  ;;  %v1376_v39 = vmul.f32 %v4493_v0, %v1311_v48  ;;  %v1419_v21 = vmul.f32 %v4588_v24, %v3891_v36  ;;  %v4591_v50 = vld [vmem:[#allocation102_spill] sm:$0xff]  ;;  %v4592_v12 = vld [vmem:[#allocation104_spill] sm:$0xff] }
 0x1a0   : > { %v1421_v6 = vmul.f32 %v4588_v24, %v3846_v51  ;;  %v1747_v56 = vrot.slane %v1746_v14, 1  ;;  %v1390_v43 = vadd.f32 %v1374_v20, %v1280_v49  ;;  %v1529_v32 = vmul.f32 %v4529_v19, %v3744_v37 }
 0x1a1   : > { %v1531_v63 = vmul.f32 %v4529_v19, %v3731_v15  ;;  %v1223_v30 = vmul.f32 %v4589_v62, %v1158_v11  ;;  %v1392_v23 = vadd.f32 %v1376_v39, %v1282_v45  ;;  %v1484_v8 = vmul.f32 %v4492_v1, %v1419_v21  ;;  %v4597_v11 = vld [vmem:[#allocation16_spill] sm:$0xff] }
 0x1a2   : > { %v1486_v0 = vmul.f32 %v4496_v47, %v1421_v6  ;;  %v4012_v33 = vadd.f32 %v1747_v56, %v1746_v14  ;;  %v1594_v36 = vmul.f32 %v3370_v42, %v1529_v32  ;;  %v1639_v3 = vmul.f32 %v4590_v16, %v1025_v61  ;;  %v4598_v6 = vld [vmem:[#allocation15_spill] sm:$0xff] }
 0x1a3   : > { %v1596_v51 = vmul.f32 %v4502_v5, %v1531_v63  ;;  %v1500_v26 = vadd.f32 %v1484_v8, %v1390_v43  ;;  %v1641_v15 = vmul.f32 %v4590_v16, %v3961_v2  ;;  %v1707_v35 = vmul.f32 %v4592_v12, %v4591_v50  ;;  %v4605_v50 = vld [vmem:[#allocation86_spill] sm:$0xff] }
 0x1a4   : > { %v1502_v37 = vadd.f32 %v1486_v0, %v1392_v23  ;;  %v1704_v1 = vmul.f32 %v3557_v57, %v1639_v3  ;;  %v4593_v47 = vrot.slane %v3782_v46, 7  ;;  %v4594_v17 = vrot.slane %v3875_v54, 7  ;;  %v4599_v23 = vld [vmem:[#allocation23_spill] sm:$0xff] }
 0x1a5   : > { %v4596_v61 = vrot.slane %v3807_v22, 7  ;;  %v880_v49 = vmul.f32 %v4597_v11, %v3813_v53  ;;  %v1610_v48 = vadd.f32 %v1594_v36, %v1500_v26  ;;  %v1706_v57 = vmul.f32 %v4592_v12, %v1641_v15  ;;  %v4610_v11 = vld [vmem:[#allocation41_spill] sm:$0xff] }
 0x1a6   : > { %v782_v42 = vsel %vm779_vm0, %v4594_v17, %v4593_v47  ;;  %v4595_v5 = vmov %v4594_v17  ;;  %v1612_v14 = vadd.f32 %v1596_v51, %v1502_v37  ;;  %v1723_v45 = vadd.f32 %v1707_v35, %v3725_v58  ;;  %v4604_v37 = vld [vmem:[#allocation85_spill] sm:$0xff] }
 0x1a7   : > { %v784_v59 = vsel %vm779_vm0, %v4596_v61, %v4595_v5  ;;  %v1239_v20 = vadd.f32 %v1223_v30, %v1129_v41  ;;  %v822_v21 = vmul.f32 %v4543_v60, %v782_v42  ;;  %v882_v56 = vmul.f32 %v4598_v6, %v3895_v18  ;;  %v4609_v61 = vld [vmem:[#allocation71_spill] sm:$0xff]  ;;  %v4613_v6 = vld [vmem:[#allocation40_spill] sm:$0xff] }
 0x1a8   : > { %v820_v39 = vmul.f32 %v4543_v60, %v784_v59  ;;  %v1720_v43 = vadd.f32 %v1704_v1, %v1610_v48  ;;  %v1722_v32 = vadd.f32 %v1706_v57, %v1612_v14  ;;  %v1765_v63 = vadd.f32 %v3646_v4, %v1723_v45  ;;  %v4611_v48 = vld [vmem:[#allocation6_spill] sm:$0xff]  ;;  %v4612_v57 = vld [vmem:[#allocation36_spill] sm:$0xff] }
 0x1a9   : > { %v990_v53 = vadd.f32 %v3816_v44, %v880_v49  ;;  %v886_v8 = vmul.f32 %v4599_v23, %v822_v21  ;;  %v4600_v58 = vrot.slane %v3832_v7, 1  ;;  %v4601_v41 = vrot.slane %v3782_v46, 1 }
 0x1aa   : > { %v884_v62 = vmul.f32 %v4497_v34, %v820_v39  ;;  %v1762_v44 = vadd.f32 %v4012_v33, %v1720_v43  ;;  %v1764_v34 = vadd.f32 %v4012_v33, %v1722_v32  ;;  %2502 = vrcp.f32 %v1765_v63  ;;  %v4614_v43 = vld [vmem:[#allocation39_spill] sm:$0xff]  ;;  %v4615_v63 = vld [vmem:[#allocation24_spill] sm:$0xff] }
 0x1ab   : > { %v4052_v60 = vsel %vm1014_vm1, %v4601_v41, %v4600_v58  ;;  %v4602_v18 = vmov %v4601_v41  ;;  %v4603_v7 = vrot.slane %v3807_v22, 1  ;;  %v992_v36 = vadd.f32 %v3863_v28, %v882_v56  ;;  %v4607_v28 = vld [vmem:[#allocation31_spill] sm:$0xff]  ;;  %v4616_v41 = vld [vmem:[#allocation45_spill] sm:$0xff] }
 0x1ac   : > { %v1017_v30 = vsel %vm1014_vm1, %v1008_v29, %v4602_v18  ;;  %v994_v51 = vadd.f32 %v3973_v25, %v884_v62  ;;  %v1052_v3 = vmul.f32 %v4578_v38, %v3871_v27  ;;  %v1826_v15 = vmul.f32 %v4604_v37, %v1762_v44  ;;  %v4608_v25 = vld [vmem:[#allocation73_spill] sm:$0xff]  ;;  %v4617_v44 = vld [vmem:[#allocation35_spill] sm:$0xff] }
 0x1ad   : > { %v4068_v0 = vsel %vm1014_vm1, %v4603_v7, %v1008_v29  ;;  %v1827_v12 = vmul.f32 %v4605_v50, %v1764_v34  ;;  %v1056_v35 = vmul.f32 %v4578_v38, %v1017_v30  ;;  %v1058_v10 = vmul.f32 %v4578_v38, %v4052_v60  ;;  %v4606_v29 = vld [vmem:[#allocation32_spill] sm:$0xff] }
 0x1ae   : > { %v1054_v26 = vmul.f32 %v4578_v38, %v4068_v0  ;;  %v1117_v1 = vmul.f32 %v4606_v29, %v1052_v3  ;;  %v1162_v17 = vmul.f32 %v4547_v52, %v4608_v25  ;;  %v1164_v5 = vmul.f32 %v4547_v52, %v784_v59 }
 0x1af   : > { %v1225_v49 = vmul.f32 %v4610_v11, %v4609_v61  ;;  %v996_v14 = vadd.f32 %v4611_v48, %v886_v8  ;;  %v1121_v45 = vmul.f32 %v4612_v57, %v1056_v35  ;;  %v1166_v39 = vmul.f32 %v4547_v52, %v782_v42 }
 0x1b0   : > { %v1119_v47 = vmul.f32 %v4607_v28, %v1054_v26  ;;  %v1133_v21 = vadd.f32 %v1117_v1, %v990_v53  ;;  %v1227_v56 = vmul.f32 %v4613_v6, %v1162_v17  ;;  %v1229_v32 = vmul.f32 %v4614_v43, %v1164_v5  ;;  %v4620_v28 = vld [vmem:[#allocation60_spill] sm:$0xff]  ;;  %v4622_v5 = vld [vmem:[#allocation70_spill] sm:$0xff] }
 0x1b1   : > { %v1284_v62 = vadd.f32 %v4615_v63, %v1239_v20  ;;  %v1313_v23 = vmul.f32 %v4565_v40, %v3961_v2  ;;  %v1137_v58 = vadd.f32 %v1121_v45, %v994_v51  ;;  %v1231_v18 = vmul.f32 %v4616_v41, %v1166_v39  ;;  %v4625_v39 = vld [vmem:[#allocation53_spill] sm:$0xff]  ;;  %v4629_v41 = vld [vmem:[#allocation46_spill] sm:$0xff] }
 0x1b2   : > { %v1135_v38 = vadd.f32 %v1119_v47, %v992_v36  ;;  %v1123_v8 = vmul.f32 %v4617_v44, %v1058_v10  ;;  %v1243_v34 = vadd.f32 %v1227_v56, %v1133_v21  ;;  %v1272_v52 = vmul.f32 %v4524_v31, %v3807_v22  ;;  %v4618_v22 = vld [vmem:[#allocation49_spill] sm:$0xff]  ;;  %v4621_v47 = vld [vmem:[#allocation44_spill] sm:$0xff] }
 0x1b3   : > { %v1247_v53 = vadd.f32 %v1231_v18, %v1137_v58  ;;  %v1274_v36 = vmul.f32 %v4524_v31, %v3875_v54  ;;  %v1317_v20 = vmul.f32 %v4565_v40, %v4068_v0  ;;  %v1319_v3 = vmul.f32 %v4565_v40, %v1017_v30  ;;  %v4619_v31 = vld [vmem:[#allocation51_spill] sm:$0xff]  ;;  %v4630_v18 = vld [vmem:[#allocation105_spill] sm:$0xff] }
 0x1b4   : > { %v1245_v7 = vadd.f32 %v1229_v32, %v1135_v38  ;;  %v1139_v2 = vadd.f32 %v1123_v8, %v996_v14  ;;  %v1288_v51 = vadd.f32 %v1272_v52, %v1243_v34  ;;  %v1321_v26 = vmul.f32 %v4565_v40, %v4052_v60  ;;  %v4623_v40 = vld [vmem:[#allocation79_spill] sm:$0xff]  ;;  %v4627_v32 = vld [vmem:[#allocation57_spill] sm:$0xff]  ;;  %v4632_v34 = vld [vmem:[#allocation94_spill] sm:$0xff] }
 0x1b5   : > { %v1427_v37 = vmul.f32 %v4588_v24, %v784_v59  ;;  %v1241_v50 = vadd.f32 %v1225_v49, %v3998_v55  ;;  %v1382_v10 = vmul.f32 %v4618_v22, %v1317_v20  ;;  %v1429_v29 = vmul.f32 %v4588_v24, %v782_v42  ;;  %v4624_v59 = vld [vmem:[#allocation48_spill] sm:$0xff]  ;;  %v4626_v38 = vld [vmem:[#allocation59_spill] sm:$0xff] }
 0x1b6   : > { %v1290_v35 = vadd.f32 %v1274_v36, %v1245_v7  ;;  %v1378_v1 = vmul.f32 %v4619_v31, %v1313_v23  ;;  %v1233_v17 = vmul.f32 %v4621_v47, %v4620_v28  ;;  %v1292_v61 = vadd.f32 %v4622_v5, %v1247_v53  ;;  %v4628_v23 = vld [vmem:[#allocation97_spill] sm:$0xff]  ;;  %v4633_v52 = vld [vmem:[#allocation8_spill] sm:$0xff]  ;;  %v4634_v53 = vld [vmem:[#allocation50_spill] sm:$0xff] }
 0x1b7   : > { %v1537_v11 = vmul.f32 %v4529_v19, %v3875_v54  ;;  %v1842_v48 = vmul.f32 %v4623_v40, %v1826_v15  ;;  %v1384_v14 = vmul.f32 %v4624_v59, %v1319_v3  ;;  %v1398_v55 = vadd.f32 %v1382_v10, %v1288_v51  ;;  %v2503_v57 = vpop.eup %2502  ;;  %v4635_v36 = vld [vmem:[#allocation108_spill] sm:$0xff]  ;;  %v4636_v3 = vld [vmem:[#allocation47_spill] sm:$0xff]  ;;  %v4641_v5 = vld [vmem:[#allocation69_spill] sm:$0xff] }
 0x1b8   : > { %v1539_v49 = vmul.f32 %v4529_v19, %v3782_v46  ;;  %v1394_v42 = vadd.f32 %v1378_v1, %v1284_v62  ;;  %v1249_v45 = vadd.f32 %v1233_v17, %v1139_v2  ;;  %v1386_v21 = vmul.f32 %v4625_v39, %v1321_v26  ;;  %v4631_v19 = vld [vmem:[#allocation100_spill] sm:$0xff] }
 0x1b9   : > { %v1492_v6 = vmul.f32 %v4626_v38, %v1427_v37  ;;  %v1843_v56 = vmul.f32 %v2503_v57, %v1827_v12  ;;  %v1400_v43 = vadd.f32 %v1384_v14, %v1290_v35  ;;  %v1494_v63 = vmul.f32 %v4627_v32, %v1429_v29  ;;  %v4639_v29 = vld [vmem:[#allocation67_spill] sm:$0xff]  ;;  %v4640_v1 = vld [vmem:[#allocation64_spill] sm:$0xff]  ;;  %v4645_v14 = vld [vmem:[#allocation98_spill] sm:$0xff] }
 0x1ba   : > { %v1647_v54 = vmul.f32 %v4590_v16, %v1017_v30  ;;  %v1402_v15 = vadd.f32 %v1386_v21, %v1292_v61  ;;  %v1602_v58 = vmul.f32 %v4628_v23, %v1537_v11  ;;  %v1715_v44 = vmul.f32 %v4630_v18, %v4629_v41  ;;  %v4637_v30 = vld [vmem:[#allocation87_spill] sm:$0xff]  ;;  %v4646_v57 = vld [vmem:[#allocation37_spill] sm:$0xff]  ;;  %v4647_v21 = vld [vmem:[#allocation38_spill] sm:$0xff] }
 0x1bb   : > { %v1286_v46 = vadd.f32 %v4631_v19, %v1241_v50  ;;  %v1850_v62 = vpack.c.bf16 %v1843_v56, %v1842_v48  ;;  %v1508_v8 = vadd.f32 %v1492_v6, %v1398_v55  ;;  %v1604_v7 = vmul.f32 %v4632_v34, %v1539_v49  ;;  %v4638_v50 = vld [vmem:[#allocation107_spill] sm:$0xff]  ;;  %v4648_v38 = vld [vmem:[#allocation17_spill] sm:$0xff]  ;;  %v4649_v6 = vld [vmem:[#allocation52_spill] sm:$0xff] }
 0x1bc   : > { %v1380_v12 = vmul.f32 %v4634_v53, %v4633_v52  ;;  %v1731_v20 = vadd.f32 %v1715_v44, %v4635_v36  ;;  %2504 = vrcp.f32 %v4636_v3  ;;  %v1423_v2 = vmul.f32 %v4588_v24, %v4637_v30  ;;  %v4652_v41 = vld [vmem:[#allocation7_spill] sm:$0xff]  ;;  %v4654_v34 = vld [vmem:[#allocation77_spill] sm:$0xff] }
 0x1bd   : > { %v1425_v51 = vmul.f32 %v4588_v24, %v4608_v25  ;;  %2332 = vmatprep.mubr.bf16.mxu0 %v1850_v62  ;;  %v1510_v26 = vadd.f32 %v1494_v63, %v1400_v43  ;;  %v1649_v37 = vmul.f32 %v4590_v16, %v4052_v60  ;;  %v1712_v35 = vmul.f32 %v4638_v50, %v1647_v54  ;;  %v4642_v25 = vld [vmem:[#allocation99_spill] sm:$0xff]  ;;  %v4643_v60 = vld [vmem:[#allocation72_spill] sm:$0xff]  ;;  %v4653_v62 = vld [vmem:[#allocation82_spill] sm:$0xff] }
 0x1be   : > { %v1396_v22 = vadd.f32 %v1380_v12, %v1286_v46  ;;  %v1773_v10 = vadd.f32 %v3646_v4, %v1731_v20  ;;  %v1488_v31 = vmul.f32 %v4639_v29, %v1423_v2  ;;  %v1643_v47 = vmul.f32 %v4590_v16, %v3871_v27  ;;  %v4644_v4 = vld [vmem:[#allocation83_spill] sm:$0xff]  ;;  %v4650_v63 = vld [vmem:[#allocation56_spill] sm:$0xff] }
 0x1bf   : > { %v1490_v28 = vmul.f32 %v4640_v1, %v1425_v51  ;;  %v1618_v17 = vadd.f32 %v1602_v58, %v1508_v8  ;;  %v1598_v61 = vmul.f32 %v4642_v25, %v4641_v5  ;;  %v1645_v11 = vmul.f32 %v4590_v16, %v4068_v0  ;;  %v4655_v12 = vld [vmem:[#allocation76_spill] sm:$0xff]  ;;  %v4656_v36 = vld [vmem:[#allocation103_spill] sm:$0xff]  ;;  %v4661_v1 = vld [vmem:[#allocation54_spill] sm:$0xff] }
 0x1c0   : > { %v1294_v40 = vadd.f32 %v4643_v60, %v1249_v45  ;;  %2506 = vrcp.f32 %v1773_v10  ;;  %v1504_v48 = vadd.f32 %v1488_v31, %v1394_v42  ;;  %v1600_v55 = vmul.f32 %v4645_v14, %v4644_v4  ;;  %v4651_v45 = vld [vmem:[#allocation80_spill] sm:$0xff]  ;;  %v4660_v10 = vld [vmem:[#allocation89_spill] sm:$0xff]  ;;  %v4663_v5 = vld [vmem:[#allocation90_spill] sm:$0xff] }
 0x1c1   : > { %v1506_v59 = vadd.f32 %v1490_v28, %v1396_v22  ;;  %v1620_v49 = vadd.f32 %v1604_v7, %v1510_v26  ;;  %v1708_v39 = vmul.f32 %v4646_v57, %v1643_v47  ;;  %v1710_v27 = vmul.f32 %v4647_v21, %v1645_v11  ;;  %v4657_v26 = vld [vmem:[#allocation106_spill] sm:$0xff]  ;;  %v4665_v11 = vld [vmem:[#allocation96_spill] sm:$0xff] }
 0x1c2   : > { %v1388_v56 = vmul.f32 %v4649_v6, %v4648_v38  ;;  %v1614_v43 = vadd.f32 %v1598_v61, %v1504_v48  ;;  %v1431_v0 = vmul.f32 %v4588_v24, %v4650_v63  ;;  %v1433_v42 = vmul.f32 %v4588_v24, %v4651_v45  ;;  %v4668_v6 = vld [vmem:[#allocation93_spill] sm:$0xff] }
 0x1c3   : > { %v1616_v32 = vadd.f32 %v1600_v55, %v1506_v59  ;;  %v1714_v54 = vmul.f32 %v4630_v18, %v1649_v37  ;;  %v1728_v23 = vadd.f32 %v1712_v35, %v1618_v17  ;;  %v1651_v44 = vmul.f32 %v4590_v16, %v4652_v41  ;;  %v4658_v37 = vld [vmem:[#allocation101_spill] sm:$0xff]  ;;  %v4659_v35 = vld [vmem:[#allocation88_spill] sm:$0xff]  ;;  %v4666_v59 = vld [vmem:[#allocation91_spill] sm:$0xff] }
 0x1c4   : > { %v1404_v58 = vadd.f32 %v1388_v56, %v1294_v40  ;;  %v1724_v19 = vadd.f32 %v1708_v39, %v1614_v43  ;;  %v1496_v8 = vmul.f32 %v4653_v62, %v1431_v0  ;;  %v1498_v7 = vmul.f32 %v4654_v34, %v1433_v42  ;;  %v4669_v63 = vld [vmem:[#allocation5_spill] sm:$0xff] }
 0x1c5   : > { %v1726_v46 = vadd.f32 %v1710_v27, %v1616_v32  ;;  %v1730_v52 = vadd.f32 %v1714_v54, %v1620_v49  ;;  %v1770_v53 = vadd.f32 %v4012_v33, %v1728_v23  ;;  %v1606_v20 = vmul.f32 %v4656_v36, %v4655_v12  ;;  %v4667_v27 = vld [vmem:[#allocation92_spill] sm:$0xff] }
 0x1c6   : > { %v1653_v24 = vmul.f32 %v4590_v16, %v3934_v9  ;;  %v1766_v18 = vadd.f32 %v4012_v33, %v1724_v19  ;;  %v1512_v30 = vadd.f32 %v1496_v8, %v1402_v15  ;;  %v1514_v2 = vadd.f32 %v1498_v7, %v1404_v58  ;;  %v4662_v16 = vld [vmem:[#allocation55_spill] sm:$0xff]  ;;  %v4664_v15 = vld [vmem:[#allocation28_spill] sm:$0xff] }
 0x1c7   : > { %v1768_v3 = vadd.f32 %v4012_v33, %v1726_v46  ;;  %v1772_v51 = vadd.f32 %v4012_v33, %v1730_v52  ;;  %v1608_v50 = vmul.f32 %v4658_v37, %v4657_v26  ;;  %v1716_v28 = vmul.f32 %v4661_v1, %v1651_v44 }
 0x1c8   : > { %v1828_v22 = vmul.f32 %v4659_v35, %v1766_v18  ;;  %v1622_v31 = vadd.f32 %v1606_v20, %v1512_v30  ;;  %v1718_v17 = vmul.f32 %v4662_v16, %v1653_v24  ;;  %v1830_v25 = vmul.f32 %v4663_v5, %v1770_v53 }
 0x1c9   : > { %v1829_v29 = vmul.f32 %v4660_v10, %v1768_v3  ;;  %v2505_v47 = vpop.eup %2504  ;;  %v1624_v9 = vadd.f32 %v1608_v50, %v1514_v2  ;;  %v1831_v4 = vmul.f32 %v4666_v59, %v1772_v51 }
 0x1ca   : > { %v1844_v61 = vmul.f32 %v4664_v15, %v1828_v22  ;;  %v1732_v40 = vadd.f32 %v1716_v28, %v1622_v31  ;;  %v1846_v14 = vmul.f32 %v2505_v47, %v1830_v25 }
 0x1cb   : > { %v1845_v60 = vmul.f32 %v4665_v11, %v1829_v29  ;;  %v1734_v48 = vadd.f32 %v1718_v17, %v1624_v9 }
 0x1cc   : > { %v1774_v49 = vadd.f32 %v4012_v33, %v1732_v40 }
 0x1cd   : > { %v1851_v55 = vpack.c.bf16 %v1845_v60, %v1844_v61  ;;  %v2507_v57 = vpop.eup %2506  ;;  %v1776_v39 = vadd.f32 %v4012_v33, %v1734_v48  ;;  %v2213_v33 = vld [vmem:[%s4250_s4] ss:$0 sm:$0xff] }
 0x1ce   : > { %v1847_v21 = vmul.f32 %v2507_v57, %v1831_v4  ;;  %v1832_v38 = vmul.f32 %v4667_v27, %v1774_v49 }
 0x1cf   : > { %2333 = vmatmul.mubr.bf16.vlgmr.msra.gmra.mxu0 %v1851_v55  ;;  %v1833_v56 = vmul.f32 %v4668_v6, %v1776_v39 }
 0x1d0   : > { %v1852_v43 = vpack.c.bf16 %v1847_v21, %v1846_v14  ;;  %v1848_v32 = vmul.f32 %v3991_v13, %v1832_v38 }
 0x1d1   : > { %v1849_v0 = vmul.f32 %v4669_v63, %v1833_v56 }
 0x1d2   : > { %2336 = vmatprep.mubr.bf16.mxu1 %v1852_v43 }
 0x1d3   : > { %v1853_v45 = vpack.c.bf16 %v1849_v0, %v1848_v32 }
 0x1d5   : > { %2337 = vmatmul.mubr.bf16.vlgmr.msra.gmra.mxu1 %v1853_v45 }
 0x28f   : > { %v2334_v42 = vpop.f32.mrf.mxu0 }
 0x290   : > { %v1968_v58 = vadd.f32 %v2334_v42, %v2213_v33 }
 0x291   : > { %v1959_v54 = vpop.f32.mrf.mxu0 }
 0x292   : > { %v1960_v19 = vadd.f32 %v2213_v33, %v1959_v54 }
 0x293   : > { %v2335_v23 = vpop.f32.mrf.mxu0 }
 0x294   : > { %v1971_v41 = vadd.f32 %v2335_v23, %v2213_v33 }
 0x295   : > { %v1962_v44 = vpop.f32.mrf.mxu0  ;;  %v2338_v13 = vpop.f32.mrf.mxu1 }
 0x296   : > { %v2253_v46 = vpack.c.bf16 %v1971_v41, %v1968_v58  ;;  %v1963_v62 = vadd.f32 %v2213_v33, %v1962_v44  ;;  %v1984_v52 = vadd.f32 %v2338_v13, %v2213_v33 }
 0x297   : > { %v1975_v8 = vpop.f32.mrf.mxu1 }
 0x298   : > { %2265 = vst [vmem:[%s298_s22 + $0x8] sm:$0xff] %v2253_v46   ;;  %v2248_v34 = vpack.c.bf16 %v1963_v62, %v1960_v19  ;;  %v1976_v36 = vadd.f32 %v2213_v33, %v1975_v8 }
 0x299   : > { %v2339_v7 = vpop.f32.mrf.mxu1 }
 0x29a   : > { %2249 = vst [vmem:[%s298_s22] sm:$0xff] %v2248_v34   ;;  %v1987_v53 = vadd.f32 %v2339_v7, %v2213_v33 }
 0x29b   : > { %v1978_v12 = vpop.f32.mrf.mxu1 }
 0x29c   : > { %v2263_v20 = vpack.c.bf16 %v1987_v53, %v1984_v52  ;;  %v1979_v24 = vadd.f32 %v2213_v33, %v1978_v12 }
 0x29e   : > { %2267 = vst [vmem:[%s298_s22 + $0x18] sm:$0xff] %v2263_v20   ;;  %v2258_v18 = vpack.c.bf16 %v1979_v24, %v1976_v36 }
 0x2a0   : > { %2266 = vst [vmem:[%s298_s22 + $0x10] sm:$0xff] %v2258_v18  }
 0x2a1   : > { %2521 = shalt.err (!%p2518_p3)
}
 0x2a2   : > { %s2522_s23 = scalar_lea.hbm %s4202_s19, 512  ;;  %s2526_s22 = scalar_lea.hbm %s4254_s8, 1024 }
 0x2a3   : > { %p2523_p4 = scmp.ne.s32.totalorder %s4202_s19, %s2522_s23  ;;  %p2527_p9 = scmp.lt.s32.totalorder %s4202_s19, %s4254_s8 }
 0x2a4   : > { %p2528_p10 = scmp.lt.s32.totalorder %s2526_s22, %s2522_s23 }
 0x2a5   : > { %p2524_p7 = pnand %p2523_p4, %p2657_p5 }
 0x2a6   : > { %p2529_p11 = por %p2528_p10, %p2527_p9 }
 0x2a7   : > { %p2525_p8 = pneg %p2524_p7 }
 0x2a9   : > { %p2530_p12 = pnand %p2529_p11, %p2525_p8 }
 0x2ab   : > { %2533 = shalt.err (!%p2530_p12)
}
 0x2ac   : > { %s2572_s18 = smov 64   ;;  %s2573_s9 = smov 4  }
 0x2ad   : > { %2356 = dma.vmem_to_hbm [thread:$0]  (%p2657_p5), %s4197_s10, 512, %s4202_s19, %s4206_s26, %s2572_s18, %s2572_s18, %s2573_s9  }
 0x2ae PF: > { %p2362_p13 = scmp.ge.s32.totalorder %s2568_s30, 2  ;;  %s2059_s20 = sand.u32 1, %s2556_s27  }
 0x2af   : > { %s2060_s21 = scalar_lea.sflag [#allocation3], %s2059_s20 }
 0x2b0   : > { %p2359_p0 = pnand %p2362_p13, %p2661_p6 }
 0x2b2   : > { %p2360_p1 = pneg %p2359_p0 }
 0x2b4   : > { %2551 = dma.done.wait (%p2360_p1), %s2060_s21, 512  }
 0x2b5   : > { %2553 = vsyncadd (%p2360_p1), %s2060_s21, 4294966784  ;;  %p18_p2 = scmp.ge.s32.totalorder %s2644_s11, 4   ;;  %s4670_s27 = smov %s2560_s28 }
 0x2b6   : > { %s4671_s28 = smov %s2564_s29  ;;  %s4672_s29 = smov %s2655_s14 }
 0x2b7   : > { %s4673_s30 = smov %s2644_s11  ;;  %20 = sbr.rel (!%p18_p2) target bundleno = 3 (0x3), region = 102 }
 0x2bc   :  { %2065 = vsyncpa [#allocation3], 1 }
 0x2bd   :  { %2067 = vsyncpa [#allocation3 + $0x1], 1 }

</bundles_post_ra>
